<compile_context>
chip_gen: v5e
topology: v5e:2x2
jax: 0.10.0
libtpu: 0.0.40
codegen_flags: <defaults>
</compile_context>

<pallas_src>
import functools
import math

import jax
import jax.numpy as jnp
from jax import lax
from jax.experimental import pallas as pl
from jax.experimental.pallas import tpu as pltpu

EPS = 1e-5  # nn.LayerNorm default


def _layer_norm(x, w, b):
    mu = jnp.mean(x, axis=-1, keepdims=True)
    var = jnp.mean((x - mu) ** 2, axis=-1, keepdims=True)
    return (x - mu) * lax.rsqrt(var + EPS) * w + b


def _gelu_exact(x):
    # nn.GELU default (erf-based, exact)
    return 0.5 * x * (1.0 + lax.erf(x * (1.0 / math.sqrt(2.0))))


# ------------------------------ fused kernel ---------------------------------

def fused_forward_kernel(x_ref, pos_ref,
                         lin_w_ref, lin_b_ref,
                         ln1w_ref, ln1b_ref,
                         wqkv_ref, bqkv_ref, wp_ref, bp_ref,
                         ln2w_ref, ln2b_ref,
                         fc1w_ref, fc1b_ref, fc2w_ref, fc2b_ref,
                         norm_w_ref, norm_b_ref,
                         out_w_ref, out_b_ref,
                         o_ref, *, num_heads, depth, dim):
    H = num_heads
    D = dim
    dh = D // H
    bf16 = jnp.bfloat16

    x_in = x_ref[0]                                     # (N, D) — one batch element
    n = x_in.shape[0]

    # input Linear + positional embedding
    x = jnp.dot(x_in.astype(bf16), lin_w_ref[...],
                preferred_element_type=jnp.float32)
    x = x + lin_b_ref[...] + pos_ref[...]

    def block(l, x):
        # ---- attention branch (pre-norm) ----
        h = _layer_norm(x, ln1w_ref[l], ln1b_ref[l])
        # single fused lane-dense QKV matmul (scale already folded into Q columns)
        qkv = jnp.dot(h.astype(bf16), wqkv_ref[l],
                      preferred_element_type=jnp.float32) + bqkv_ref[l]   # (N, 3D)

        attn = jnp.zeros((n, D), jnp.float32)
        for hh in range(H):                              # static, small H
            q = qkv[:, hh * dh:(hh + 1) * dh].astype(bf16)
            k = qkv[:, D + hh * dh:D + (hh + 1) * dh].astype(bf16)
            v = qkv[:, 2 * D + hh * dh:2 * D + (hh + 1) * dh].astype(bf16)
            s = jnp.einsum('ne,me->nm', q, k,
                           preferred_element_type=jnp.float32)            # (N, N)
            s = s - jnp.max(s, axis=-1, keepdims=True)
            e = jnp.exp(s)
            p = e * pl.reciprocal(jnp.sum(e, axis=-1, keepdims=True), approx=True)
            o = jnp.dot(p.astype(bf16), v,
                        preferred_element_type=jnp.float32)               # (N, dh)
            # per-head output projection accumulated directly into (N, D)
            attn = attn + jnp.dot(o.astype(bf16), wp_ref[l, hh],
                                  preferred_element_type=jnp.float32)
        x = x + attn + bp_ref[l]

        # ---- MLP branch (pre-norm) ----
        h = _layer_norm(x, ln2w_ref[l], ln2b_ref[l])
        h = jnp.dot(h.astype(bf16), fc1w_ref[l],
                    preferred_element_type=jnp.float32) + fc1b_ref[l]
        h = _gelu_exact(h)
        h = jnp.dot(h.astype(bf16), fc2w_ref[l],
                    preferred_element_type=jnp.float32) + fc2b_ref[l]
        return x + h

    x = lax.fori_loop(0, depth, block, x, unroll=depth <= 4)

    # fused final norm + (folded) output head
    x = _layer_norm(x, norm_w_ref[...], norm_b_ref[...])
    x = jnp.dot(x.astype(bf16), out_w_ref[...],
                preferred_element_type=jnp.float32) + out_b_ref[...]
    o_ref[0] = x


# ------------------------------ wrapper ---------------------------------------

def transformer_encoder_forward(params, x, *, num_heads):
    B, N, D = x.shape
    assert D % num_heads == 0
    depth = params['qkv_w'].shape[0]
    dh = D // num_heads
    scale = dh ** -0.5
    bf16 = jnp.bfloat16

    # positional embedding, matching the PyTorch forward's shape check
    pos = params['pos']                                  # (num_pose, D)
    if pos.shape[0] == N:
        pos_eff = pos
    else:
        pos_eff = jnp.broadcast_to(pos[N][None, :], (N, D))
    pos_eff = pos_eff.astype(jnp.float32)

    # fold the 1/sqrt(dh) score scale into the Q part of the fused QKV weight/bias
    wqkv = jnp.concatenate([params['qkv_w'][:, :, :D] * scale,
                            params['qkv_w'][:, :, D:]], axis=-1)          # (L, D, 3D)
    bqkv = jnp.concatenate([params['qkv_b'][:, :, :D] * scale,
                            params['qkv_b'][:, :, D:]], axis=-1)          # (L, 1, 3D)
    # per-head arrangement of the output projection: rows of proj_w are (h, e)
    wp = params['proj_w'].reshape(depth, num_heads, dh, D)                # (L, H, dh, D)
    # output head Linear -> LeakyReLU(True) (identity) -> Linear folded to one matmul
    out_w = params['out1_w'] @ params['out2_w']
    out_b = params['out1_b'] @ params['out2_w'] + params['out2_b']

    resident = [
        pos_eff,
        params['lin_w'].astype(bf16), params['lin_b'],
        params['ln1_w'], params['ln1_b'],
        wqkv.astype(bf16), bqkv,
        wp.astype(bf16), params['proj_b'],
        params['ln2_w'], params['ln2_b'],
        params['fc1_w'].astype(bf16), params['fc1_b'],
        params['fc2_w'].astype(bf16), params['fc2_b'],
        params['norm_w'], params['norm_b'],
        out_w.astype(bf16), out_b,
    ]

    def resident_spec(a):
        nd = a.ndim
        return pl.BlockSpec(a.shape, lambda b, _nd=nd: (0,) * _nd)

    batch_spec = pl.BlockSpec((1, N, D), lambda b: (b, 0, 0))

    # explicit scoped-VMEM budget: double-buffered resident weights + headroom,
    # floored at the v5e default and capped below v7x's 64 MiB physical VMEM.
    resident_bytes = sum(int(a.size) * a.dtype.itemsize for a in resident)
    vmem_limit = int(min(56 * 2**20, max(16 * 2**20, 2 * resident_bytes + 4 * 2**20)))

    kernel = functools.partial(fused_forward_kernel, num_heads=num_heads,
                               depth=depth, dim=D)
    out = pl.pallas_call(
        kernel,
        out_shape=jax.ShapeDtypeStruct((B, N, D), jnp.float32),
        grid=(B,),
        in_specs=[batch_spec] + [resident_spec(a) for a in resident],
        out_specs=batch_spec,
        compiler_params=pltpu.CompilerParams(
            dimension_semantics=("parallel",),
            vmem_limit_bytes=vmem_limit),
    )(x.astype(jnp.float32), *resident)
    return out


# ------------------------------ parameters ------------------------------------

def init_params(key, *, num_pose, pose_dim, depth, num_heads, mlp_ratio):
    D = pose_dim
    Hm = int(D * mlp_ratio)
    keys = iter(jax.random.split(key, 4 * depth + 8))

    def xavier(k, fi, fo):
        a = math.sqrt(6.0 / (fi + fo))
        return jax.random.uniform(k, (fi, fo), jnp.float32, -a, a)

    p = {
        'lin_w': xavier(next(keys), D, D),
        'lin_b': jnp.zeros((1, D), jnp.float32),
        'pos': jax.random.normal(next(keys), (num_pose, D), jnp.float32),
        'norm_w': jnp.ones((1, D), jnp.float32),
        'norm_b': jnp.zeros((1, D), jnp.float32),
        'out1_w': xavier(next(keys), D, D),
        'out1_b': jnp.zeros((1, D), jnp.float32),
        'out2_w': xavier(next(keys), D, D),
        'out2_b': jnp.zeros((1, D), jnp.float32),
    }

    names = ('qkv_w', 'qkv_b', 'proj_w', 'proj_b',
             'ln1_w', 'ln1_b', 'ln2_w', 'ln2_b',
             'fc1_w', 'fc1_b', 'fc2_w', 'fc2_b')
    per = {k: [] for k in names}
    for _ in range(depth):
        per['qkv_w'].append(xavier(next(keys), D, 3 * D))
        per['qkv_b'].append(jnp.zeros((1, 3 * D), jnp.float32))   # qkv_bias=True, init 0
        per['proj_w'].append(xavier(next(keys), D, D))
        per['proj_b'].append(jnp.zeros((1, D), jnp.float32))
        per['ln1_w'].append(jnp.ones((1, D), jnp.float32))
        per['ln1_b'].append(jnp.zeros((1, D), jnp.float32))
        per['ln2_w'].append(jnp.ones((1, D), jnp.float32))
        per['ln2_b'].append(jnp.zeros((1, D), jnp.float32))
        per['fc1_w'].append(xavier(next(keys), D, Hm))
        per['fc1_b'].append(jnp.zeros((1, Hm), jnp.float32))
        per['fc2_w'].append(xavier(next(keys), Hm, D))
        per['fc2_b'].append(jnp.zeros((1, D), jnp.float32))

    for k, v in per.items():
        p[k] = jnp.stack(v, axis=0)
    return p


# --------------------------- pure-JAX reference --------------------------------

def reference_forward(params, x, *, num_heads):
    B, N, D = x.shape
    H = num_heads
    dh = D // H
    depth = params['qkv_w'].shape[0]

    def ln(z, w, b):
        mu = z.mean(-1, keepdims=True)
        var = ((z - mu) ** 2).mean(-1, keepdims=True)
        return (z - mu) / jnp.sqrt(var + EPS) * w + b

    h = x @ params['lin_w'] + params['lin_b']
    pos = params['pos']
    h = h + (pos[None] if pos.shape[0] == N else pos[N][None, None, :])

    for l in range(depth):
        y = ln(h, params['ln1_w'][l, 0], params['ln1_b'][l, 0])
        qkv = y @ params['qkv_w'][l] + params['qkv_b'][l, 0]
        q, k, v = jnp.split(qkv, 3, axis=-1)
        to_heads = lambda t: t.reshape(B, N, H, dh).transpose(0, 2, 1, 3)
        q, k, v = to_heads(q), to_heads(k), to_heads(v)
        s = jnp.einsum('bhnd,bhmd->bhnm', q, k) * (dh ** -0.5)
        p = jax.nn.softmax(s, axis=-1)
        a = jnp.einsum('bhnm,bhmd->bhnd', p, v)
        a = a.transpose(0, 2, 1, 3).reshape(B, N, D) @ params['proj_w'][l] \
            + params['proj_b'][l, 0]
        h = h + a
        y = ln(h, params['ln2_w'][l, 0], params['ln2_b'][l, 0])
        y = y @ params['fc1_w'][l] + params['fc1_b'][l, 0]
        y = 0.5 * y * (1.0 + lax.erf(y / math.sqrt(2.0)))
        y = y @ params['fc2_w'][l] + params['fc2_b'][l, 0]
        h = h + y

    h = ln(h, params['norm_w'][0], params['norm_b'][0])
    h = h @ params['out1_w'] + params['out1_b']
    # nn.LeakyReLU(True): True read as negative_slope == 1.0 -> identity
    h = h @ params['out2_w'] + params['out2_b']
    return h


if __name__ == "__main__":
    # small shapes consistent with the module (pose_dim must divide num_heads)
    B, NUM_POSE, POSE_DIM = 2, 8, 32
    DEPTH, NUM_HEADS, MLP_RATIO = 2, 4, 4.0

    key = jax.random.PRNGKey(0)
    kp, kx = jax.random.split(key)
    params = init_params(kp, num_pose=NUM_POSE, pose_dim=POSE_DIM,
                         depth=DEPTH, num_heads=NUM_HEADS, mlp_ratio=MLP_RATIO)
    x = jax.random.normal(kx, (B, NUM_POSE, POSE_DIM), jnp.float32)

    out = transformer_encoder_forward(params, x, num_heads=NUM_HEADS)
    out = jax.block_until_ready(out)
    assert out.shape == (B, NUM_POSE, POSE_DIM)
    assert bool(jnp.all(jnp.isfinite(out)))

    ref = reference_forward(params, x, num_heads=NUM_HEADS)
    # loose tolerance: kernel feeds bf16 matmul operands (f32 accumulation) and uses
    # the EUP approximate reciprocal in the softmax denominator
    assert bool(jnp.allclose(out, ref, atol=5e-2, rtol=5e-2)), \
        float(jnp.max(jnp.abs(out - ref)))

    print("KERNEL_OK")
</pallas_src>

<mosaic_0001>
module attributes {stable_mosaic.version = 11 : i64} {
  func.func @fused_forward_kernel(%arg0: i32, %arg1: memref<1x8x32xf32, #tpu.memory_space<vmem>>, %arg2: memref<8x32xf32, #tpu.memory_space<vmem>>, %arg3: memref<32x32xbf16, #tpu.memory_space<vmem>>, %arg4: memref<1x32xf32, #tpu.memory_space<vmem>>, %arg5: memref<2x1x32xf32, #tpu.memory_space<vmem>>, %arg6: memref<2x1x32xf32, #tpu.memory_space<vmem>>, %arg7: memref<2x32x96xbf16, #tpu.memory_space<vmem>>, %arg8: memref<2x1x96xf32, #tpu.memory_space<vmem>>, %arg9: memref<2x4x8x32xbf16, #tpu.memory_space<vmem>>, %arg10: memref<2x1x32xf32, #tpu.memory_space<vmem>>, %arg11: memref<2x1x32xf32, #tpu.memory_space<vmem>>, %arg12: memref<2x1x32xf32, #tpu.memory_space<vmem>>, %arg13: memref<2x32x128xbf16, #tpu.memory_space<vmem>>, %arg14: memref<2x1x128xf32, #tpu.memory_space<vmem>>, %arg15: memref<2x128x32xbf16, #tpu.memory_space<vmem>>, %arg16: memref<2x1x32xf32, #tpu.memory_space<vmem>>, %arg17: memref<1x32xf32, #tpu.memory_space<vmem>>, %arg18: memref<1x32xf32, #tpu.memory_space<vmem>>, %arg19: memref<32x32xbf16, #tpu.memory_space<vmem>>, %arg20: memref<1x32xf32, #tpu.memory_space<vmem>>, %arg21: memref<1x8x32xf32, #tpu.memory_space<vmem>>) attributes {dimension_semantics = [#tpu.dimension_semantics<parallel>], iteration_bounds = array<i64: 2>, scalar_prefetch = 0 : i64, scratch_operands = 0 : i64, tpu.core_type = #tpu.core_type<tc>, window_params = [{transform_indices = @transform_0, window_bounds = array<i64: 1, 8, 32>}, {pipeline_mode = #tpu.pipeline_mode<synchronous>, transform_indices = @transform_1, window_bounds = array<i64: 8, 32>}, {pipeline_mode = #tpu.pipeline_mode<synchronous>, transform_indices = @transform_2, window_bounds = array<i64: 32, 32>}, {pipeline_mode = #tpu.pipeline_mode<synchronous>, transform_indices = @transform_3, window_bounds = array<i64: 1, 32>}, {pipeline_mode = #tpu.pipeline_mode<synchronous>, transform_indices = @transform_4, window_bounds = array<i64: 2, 1, 32>}, {pipeline_mode = #tpu.pipeline_mode<synchronous>, transform_indices = @transform_5, window_bounds = array<i64: 2, 1, 32>}, {pipeline_mode = #tpu.pipeline_mode<synchronous>, transform_indices = @transform_6, window_bounds = array<i64: 2, 32, 96>}, {pipeline_mode = #tpu.pipeline_mode<synchronous>, transform_indices = @transform_7, window_bounds = array<i64: 2, 1, 96>}, {pipeline_mode = #tpu.pipeline_mode<synchronous>, transform_indices = @transform_8, window_bounds = array<i64: 2, 4, 8, 32>}, {pipeline_mode = #tpu.pipeline_mode<synchronous>, transform_indices = @transform_9, window_bounds = array<i64: 2, 1, 32>}, {pipeline_mode = #tpu.pipeline_mode<synchronous>, transform_indices = @transform_10, window_bounds = array<i64: 2, 1, 32>}, {pipeline_mode = #tpu.pipeline_mode<synchronous>, transform_indices = @transform_11, window_bounds = array<i64: 2, 1, 32>}, {pipeline_mode = #tpu.pipeline_mode<synchronous>, transform_indices = @transform_12, window_bounds = array<i64: 2, 32, 128>}, {pipeline_mode = #tpu.pipeline_mode<synchronous>, transform_indices = @transform_13, window_bounds = array<i64: 2, 1, 128>}, {pipeline_mode = #tpu.pipeline_mode<synchronous>, transform_indices = @transform_14, window_bounds = array<i64: 2, 128, 32>}, {pipeline_mode = #tpu.pipeline_mode<synchronous>, transform_indices = @transform_15, window_bounds = array<i64: 2, 1, 32>}, {pipeline_mode = #tpu.pipeline_mode<synchronous>, transform_indices = @transform_16, window_bounds = array<i64: 1, 32>}, {pipeline_mode = #tpu.pipeline_mode<synchronous>, transform_indices = @transform_17, window_bounds = array<i64: 1, 32>}, {pipeline_mode = #tpu.pipeline_mode<synchronous>, transform_indices = @transform_18, window_bounds = array<i64: 32, 32>}, {pipeline_mode = #tpu.pipeline_mode<synchronous>, transform_indices = @transform_19, window_bounds = array<i64: 1, 32>}, {transform_indices = @transform_20, window_bounds = array<i64: 1, 8, 32>}]} {
    %c0 = arith.constant 0 : index
    %c0_0 = arith.constant 0 : index
    %c0_1 = arith.constant 0 : index
    %0 = vector.load %arg1[%c0, %c0_0, %c0_1] : memref<1x8x32xf32, #tpu.memory_space<vmem>>, vector<1x8x32xf32>
    %1 = vector.shape_cast %0 : vector<1x8x32xf32> to vector<8x32xf32>
    %2 = arith.truncf %1 : vector<8x32xf32> to vector<8x32xbf16>
    %c0_2 = arith.constant 0 : index
    %c0_3 = arith.constant 0 : index
    %3 = vector.load %arg3[%c0_2, %c0_3] : memref<32x32xbf16, #tpu.memory_space<vmem>>, vector<32x32xbf16>
    %cst = arith.constant dense<0.000000e+00> : vector<8x32xf32>
    %4 = tpu.matmul %2, %3, %cst {dimension_numbers = #tpu.dot_dimension_numbers<[1], [0], [0], [1], [0, 0, 1, 1], [], []>} : vector<8x32xbf16>, vector<32x32xbf16>, vector<8x32xf32> -> vector<8x32xf32>
    %c0_4 = arith.constant 0 : index
    %c0_5 = arith.constant 0 : index
    %5 = vector.load %arg4[%c0_4, %c0_5] : memref<1x32xf32, #tpu.memory_space<vmem>>, vector<1x32xf32>
    %6 = vector.broadcast %5 : vector<1x32xf32> to vector<8x32xf32>
    %7 = arith.addf %4, %6 : vector<8x32xf32>
    %c0_6 = arith.constant 0 : index
    %c0_7 = arith.constant 0 : index
    %8 = vector.load %arg2[%c0_6, %c0_7] : memref<8x32xf32, #tpu.memory_space<vmem>>, vector<8x32xf32>
    %9 = arith.addf %7, %8 : vector<8x32xf32>
    %c0_i32 = arith.constant 0 : i32
    %10 = arith.index_cast %c0_i32 : i32 to index
    %c0_8 = arith.constant 0 : index
    %c0_9 = arith.constant 0 : index
    %11 = vector.load %arg5[%10, %c0_8, %c0_9] : memref<2x1x32xf32, #tpu.memory_space<vmem>>, vector<1x1x32xf32>
    %12 = vector.shape_cast %11 : vector<1x1x32xf32> to vector<1x32xf32>
    %13 = arith.index_cast %c0_i32 : i32 to index
    %c0_10 = arith.constant 0 : index
    %c0_11 = arith.constant 0 : index
    %14 = vector.load %arg6[%13, %c0_10, %c0_11] : memref<2x1x32xf32, #tpu.memory_space<vmem>>, vector<1x1x32xf32>
    %15 = vector.shape_cast %14 : vector<1x1x32xf32> to vector<1x32xf32>
    %cst_12 = arith.constant dense<0.000000e+00> : vector<8xf32>
    %16 = vector.multi_reduction <add>, %9, %cst_12 [1] : vector<8x32xf32> to vector<8xf32>
    %17 = vector.shape_cast %16 : vector<8xf32> to vector<8x1xf32>
    %cst_13 = arith.constant 3.200000e+01 : f32
    %18 = vector.broadcast %cst_13 : f32 to vector<8x1xf32>
    %19 = arith.divf %17, %18 : vector<8x1xf32>
    %20 = vector.broadcast %19 : vector<8x1xf32> to vector<8x32xf32>
    %21 = arith.subf %9, %20 : vector<8x32xf32>
    %22 = arith.mulf %21, %21 : vector<8x32xf32>
    %cst_14 = arith.constant dense<0.000000e+00> : vector<8xf32>
    %23 = vector.multi_reduction <add>, %22, %cst_14 [1] : vector<8x32xf32> to vector<8xf32>
    %24 = vector.shape_cast %23 : vector<8xf32> to vector<8x1xf32>
    %cst_15 = arith.constant 3.200000e+01 : f32
    %25 = vector.broadcast %cst_15 : f32 to vector<8x1xf32>
    %26 = arith.divf %24, %25 : vector<8x1xf32>
    %27 = vector.broadcast %19 : vector<8x1xf32> to vector<8x32xf32>
    %28 = arith.subf %9, %27 : vector<8x32xf32>
    %cst_16 = arith.constant 9.99999974E-6 : f32
    %29 = vector.broadcast %cst_16 : f32 to vector<8x1xf32>
    %30 = arith.addf %26, %29 : vector<8x1xf32>
    %31 = math.rsqrt %30 : vector<8x1xf32>
    %32 = vector.broadcast %31 : vector<8x1xf32> to vector<8x32xf32>
    %33 = arith.mulf %28, %32 : vector<8x32xf32>
    %34 = vector.broadcast %12 : vector<1x32xf32> to vector<8x32xf32>
    %35 = arith.mulf %33, %34 : vector<8x32xf32>
    %36 = vector.broadcast %15 : vector<1x32xf32> to vector<8x32xf32>
    %37 = arith.addf %35, %36 : vector<8x32xf32>
    %38 = arith.truncf %37 : vector<8x32xf32> to vector<8x32xbf16>
    %39 = arith.index_cast %c0_i32 : i32 to index
    %c0_17 = arith.constant 0 : index
    %c0_18 = arith.constant 0 : index
    %40 = vector.load %arg7[%39, %c0_17, %c0_18] : memref<2x32x96xbf16, #tpu.memory_space<vmem>>, vector<1x32x96xbf16>
    %41 = vector.shape_cast %40 : vector<1x32x96xbf16> to vector<32x96xbf16>
    %cst_19 = arith.constant dense<0.000000e+00> : vector<8x96xf32>
    %42 = tpu.matmul %38, %41, %cst_19 {dimension_numbers = #tpu.dot_dimension_numbers<[1], [0], [0], [1], [0, 0, 1, 1], [], []>} : vector<8x32xbf16>, vector<32x96xbf16>, vector<8x96xf32> -> vector<8x96xf32>
    %43 = arith.index_cast %c0_i32 : i32 to index
    %c0_20 = arith.constant 0 : index
    %c0_21 = arith.constant 0 : index
    %44 = vector.load %arg8[%43, %c0_20, %c0_21] : memref<2x1x96xf32, #tpu.memory_space<vmem>>, vector<1x1x96xf32>
    %45 = vector.shape_cast %44 : vector<1x1x96xf32> to vector<1x96xf32>
    %46 = vector.broadcast %45 : vector<1x96xf32> to vector<8x96xf32>
    %47 = arith.addf %42, %46 : vector<8x96xf32>
    %cst_22 = arith.constant 0.000000e+00 : f32
    %48 = vector.broadcast %cst_22 : f32 to vector<8x32xf32>
    %49 = vector.extract_strided_slice %47 {offsets = [0, 0], sizes = [8, 8], strides = [1, 1]} : vector<8x96xf32> to vector<8x8xf32>
    %50 = arith.truncf %49 : vector<8x8xf32> to vector<8x8xbf16>
    %51 = vector.extract_strided_slice %47 {offsets = [0, 32], sizes = [8, 8], strides = [1, 1]} : vector<8x96xf32> to vector<8x8xf32>
    %52 = arith.truncf %51 : vector<8x8xf32> to vector<8x8xbf16>
    %53 = vector.extract_strided_slice %47 {offsets = [0, 64], sizes = [8, 8], strides = [1, 1]} : vector<8x96xf32> to vector<8x8xf32>
    %54 = arith.truncf %53 : vector<8x8xf32> to vector<8x8xbf16>
    "tpu.trace_start"() <{level = 10 : i32, message = "ne,me->nm"}> : () -> ()
    %cst_23 = arith.constant dense<0.000000e+00> : vector<8x8xf32>
    %55 = tpu.matmul %50, %52, %cst_23 {dimension_numbers = #tpu.dot_dimension_numbers<[1], [1], [0], [0], [0, 0, 1, 0], [], []>} : vector<8x8xbf16>, vector<8x8xbf16>, vector<8x8xf32> -> vector<8x8xf32>
    "tpu.trace_stop"() : () -> ()
    %cst_24 = arith.constant dense<0xFF800000> : vector<8xf32>
    %56 = vector.multi_reduction <maximumf>, %55, %cst_24 [1] : vector<8x8xf32> to vector<8xf32>
    %57 = vector.shape_cast %56 : vector<8xf32> to vector<8x1xf32>
    %58 = vector.broadcast %57 : vector<8x1xf32> to vector<8x8xf32>
    %59 = arith.subf %55, %58 : vector<8x8xf32>
    %60 = math.exp %59 : vector<8x8xf32>
    %cst_25 = arith.constant dense<0.000000e+00> : vector<8xf32>
    %61 = vector.multi_reduction <add>, %60, %cst_25 [1] : vector<8x8xf32> to vector<8xf32>
    %62 = vector.shape_cast %61 : vector<8xf32> to vector<8x1xf32>
    %63 = tpu.reciprocal %62 {approx = true} : vector<8x1xf32> -> vector<8x1xf32>
    %64 = vector.broadcast %63 : vector<8x1xf32> to vector<8x8xf32>
    %65 = arith.mulf %60, %64 : vector<8x8xf32>
    %66 = arith.truncf %65 : vector<8x8xf32> to vector<8x8xbf16>
    %cst_26 = arith.constant dense<0.000000e+00> : vector<8x8xf32>
    %67 = tpu.matmul %66, %54, %cst_26 {dimension_numbers = #tpu.dot_dimension_numbers<[1], [0], [0], [1], [0, 0, 1, 1], [], []>} : vector<8x8xbf16>, vector<8x8xbf16>, vector<8x8xf32> -> vector<8x8xf32>
    %68 = arith.truncf %67 : vector<8x8xf32> to vector<8x8xbf16>
    %69 = arith.index_cast %c0_i32 : i32 to index
    %c0_27 = arith.constant 0 : index
    %c0_28 = arith.constant 0 : index
    %c0_29 = arith.constant 0 : index
    %70 = vector.load %arg9[%69, %c0_27, %c0_28, %c0_29] : memref<2x4x8x32xbf16, #tpu.memory_space<vmem>>, vector<1x1x8x32xbf16>
    %71 = vector.shape_cast %70 : vector<1x1x8x32xbf16> to vector<8x32xbf16>
    %cst_30 = arith.constant dense<0.000000e+00> : vector<8x32xf32>
    %72 = tpu.matmul %68, %71, %cst_30 {dimension_numbers = #tpu.dot_dimension_numbers<[1], [0], [0], [1], [0, 0, 1, 1], [], []>} : vector<8x8xbf16>, vector<8x32xbf16>, vector<8x32xf32> -> vector<8x32xf32>
    %73 = arith.addf %48, %72 : vector<8x32xf32>
    %74 = vector.extract_strided_slice %47 {offsets = [0, 8], sizes = [8, 8], strides = [1, 1]} : vector<8x96xf32> to vector<8x8xf32>
    %75 = arith.truncf %74 : vector<8x8xf32> to vector<8x8xbf16>
    %76 = vector.extract_strided_slice %47 {offsets = [0, 40], sizes = [8, 8], strides = [1, 1]} : vector<8x96xf32> to vector<8x8xf32>
    %77 = arith.truncf %76 : vector<8x8xf32> to vector<8x8xbf16>
    %78 = vector.extract_strided_slice %47 {offsets = [0, 72], sizes = [8, 8], strides = [1, 1]} : vector<8x96xf32> to vector<8x8xf32>
    %79 = arith.truncf %78 : vector<8x8xf32> to vector<8x8xbf16>
    "tpu.trace_start"() <{level = 10 : i32, message = "ne,me->nm"}> : () -> ()
    %cst_31 = arith.constant dense<0.000000e+00> : vector<8x8xf32>
    %80 = tpu.matmul %75, %77, %cst_31 {dimension_numbers = #tpu.dot_dimension_numbers<[1], [1], [0], [0], [0, 0, 1, 0], [], []>} : vector<8x8xbf16>, vector<8x8xbf16>, vector<8x8xf32> -> vector<8x8xf32>
    "tpu.trace_stop"() : () -> ()
    %cst_32 = arith.constant dense<0xFF800000> : vector<8xf32>
    %81 = vector.multi_reduction <maximumf>, %80, %cst_32 [1] : vector<8x8xf32> to vector<8xf32>
    %82 = vector.shape_cast %81 : vector<8xf32> to vector<8x1xf32>
    %83 = vector.broadcast %82 : vector<8x1xf32> to vector<8x8xf32>
    %84 = arith.subf %80, %83 : vector<8x8xf32>
    %85 = math.exp %84 : vector<8x8xf32>
    %cst_33 = arith.constant dense<0.000000e+00> : vector<8xf32>
    %86 = vector.multi_reduction <add>, %85, %cst_33 [1] : vector<8x8xf32> to vector<8xf32>
    %87 = vector.shape_cast %86 : vector<8xf32> to vector<8x1xf32>
    %88 = tpu.reciprocal %87 {approx = true} : vector<8x1xf32> -> vector<8x1xf32>
    %89 = vector.broadcast %88 : vector<8x1xf32> to vector<8x8xf32>
    %90 = arith.mulf %85, %89 : vector<8x8xf32>
    %91 = arith.truncf %90 : vector<8x8xf32> to vector<8x8xbf16>
    %cst_34 = arith.constant dense<0.000000e+00> : vector<8x8xf32>
    %92 = tpu.matmul %91, %79, %cst_34 {dimension_numbers = #tpu.dot_dimension_numbers<[1], [0], [0], [1], [0, 0, 1, 1], [], []>} : vector<8x8xbf16>, vector<8x8xbf16>, vector<8x8xf32> -> vector<8x8xf32>
    %93 = arith.truncf %92 : vector<8x8xf32> to vector<8x8xbf16>
    %94 = arith.index_cast %c0_i32 : i32 to index
    %c1 = arith.constant 1 : index
    %c0_35 = arith.constant 0 : index
    %c0_36 = arith.constant 0 : index
    %95 = vector.load %arg9[%94, %c1, %c0_35, %c0_36] : memref<2x4x8x32xbf16, #tpu.memory_space<vmem>>, vector<1x1x8x32xbf16>
    %96 = vector.shape_cast %95 : vector<1x1x8x32xbf16> to vector<8x32xbf16>
    %cst_37 = arith.constant dense<0.000000e+00> : vector<8x32xf32>
    %97 = tpu.matmul %93, %96, %cst_37 {dimension_numbers = #tpu.dot_dimension_numbers<[1], [0], [0], [1], [0, 0, 1, 1], [], []>} : vector<8x8xbf16>, vector<8x32xbf16>, vector<8x32xf32> -> vector<8x32xf32>
    %98 = arith.addf %73, %97 : vector<8x32xf32>
    %99 = vector.extract_strided_slice %47 {offsets = [0, 16], sizes = [8, 8], strides = [1, 1]} : vector<8x96xf32> to vector<8x8xf32>
    %100 = arith.truncf %99 : vector<8x8xf32> to vector<8x8xbf16>
    %101 = vector.extract_strided_slice %47 {offsets = [0, 48], sizes = [8, 8], strides = [1, 1]} : vector<8x96xf32> to vector<8x8xf32>
    %102 = arith.truncf %101 : vector<8x8xf32> to vector<8x8xbf16>
    %103 = vector.extract_strided_slice %47 {offsets = [0, 80], sizes = [8, 8], strides = [1, 1]} : vector<8x96xf32> to vector<8x8xf32>
    %104 = arith.truncf %103 : vector<8x8xf32> to vector<8x8xbf16>
    "tpu.trace_start"() <{level = 10 : i32, message = "ne,me->nm"}> : () -> ()
    %cst_38 = arith.constant dense<0.000000e+00> : vector<8x8xf32>
    %105 = tpu.matmul %100, %102, %cst_38 {dimension_numbers = #tpu.dot_dimension_numbers<[1], [1], [0], [0], [0, 0, 1, 0], [], []>} : vector<8x8xbf16>, vector<8x8xbf16>, vector<8x8xf32> -> vector<8x8xf32>
    "tpu.trace_stop"() : () -> ()
    %cst_39 = arith.constant dense<0xFF800000> : vector<8xf32>
    %106 = vector.multi_reduction <maximumf>, %105, %cst_39 [1] : vector<8x8xf32> to vector<8xf32>
    %107 = vector.shape_cast %106 : vector<8xf32> to vector<8x1xf32>
    %108 = vector.broadcast %107 : vector<8x1xf32> to vector<8x8xf32>
    %109 = arith.subf %105, %108 : vector<8x8xf32>
    %110 = math.exp %109 : vector<8x8xf32>
    %cst_40 = arith.constant dense<0.000000e+00> : vector<8xf32>
    %111 = vector.multi_reduction <add>, %110, %cst_40 [1] : vector<8x8xf32> to vector<8xf32>
    %112 = vector.shape_cast %111 : vector<8xf32> to vector<8x1xf32>
    %113 = tpu.reciprocal %112 {approx = true} : vector<8x1xf32> -> vector<8x1xf32>
    %114 = vector.broadcast %113 : vector<8x1xf32> to vector<8x8xf32>
    %115 = arith.mulf %110, %114 : vector<8x8xf32>
    %116 = arith.truncf %115 : vector<8x8xf32> to vector<8x8xbf16>
    %cst_41 = arith.constant dense<0.000000e+00> : vector<8x8xf32>
    %117 = tpu.matmul %116, %104, %cst_41 {dimension_numbers = #tpu.dot_dimension_numbers<[1], [0], [0], [1], [0, 0, 1, 1], [], []>} : vector<8x8xbf16>, vector<8x8xbf16>, vector<8x8xf32> -> vector<8x8xf32>
    %118 = arith.truncf %117 : vector<8x8xf32> to vector<8x8xbf16>
    %119 = arith.index_cast %c0_i32 : i32 to index
    %c2 = arith.constant 2 : index
    %c0_42 = arith.constant 0 : index
    %c0_43 = arith.constant 0 : index
    %120 = vector.load %arg9[%119, %c2, %c0_42, %c0_43] : memref<2x4x8x32xbf16, #tpu.memory_space<vmem>>, vector<1x1x8x32xbf16>
    %121 = vector.shape_cast %120 : vector<1x1x8x32xbf16> to vector<8x32xbf16>
    %cst_44 = arith.constant dense<0.000000e+00> : vector<8x32xf32>
    %122 = tpu.matmul %118, %121, %cst_44 {dimension_numbers = #tpu.dot_dimension_numbers<[1], [0], [0], [1], [0, 0, 1, 1], [], []>} : vector<8x8xbf16>, vector<8x32xbf16>, vector<8x32xf32> -> vector<8x32xf32>
    %123 = arith.addf %98, %122 : vector<8x32xf32>
    %124 = vector.extract_strided_slice %47 {offsets = [0, 24], sizes = [8, 8], strides = [1, 1]} : vector<8x96xf32> to vector<8x8xf32>
    %125 = arith.truncf %124 : vector<8x8xf32> to vector<8x8xbf16>
    %126 = vector.extract_strided_slice %47 {offsets = [0, 56], sizes = [8, 8], strides = [1, 1]} : vector<8x96xf32> to vector<8x8xf32>
    %127 = arith.truncf %126 : vector<8x8xf32> to vector<8x8xbf16>
    %128 = vector.extract_strided_slice %47 {offsets = [0, 88], sizes = [8, 8], strides = [1, 1]} : vector<8x96xf32> to vector<8x8xf32>
    %129 = arith.truncf %128 : vector<8x8xf32> to vector<8x8xbf16>
    "tpu.trace_start"() <{level = 10 : i32, message = "ne,me->nm"}> : () -> ()
    %cst_45 = arith.constant dense<0.000000e+00> : vector<8x8xf32>
    %130 = tpu.matmul %125, %127, %cst_45 {dimension_numbers = #tpu.dot_dimension_numbers<[1], [1], [0], [0], [0, 0, 1, 0], [], []>} : vector<8x8xbf16>, vector<8x8xbf16>, vector<8x8xf32> -> vector<8x8xf32>
    "tpu.trace_stop"() : () -> ()
    %cst_46 = arith.constant dense<0xFF800000> : vector<8xf32>
    %131 = vector.multi_reduction <maximumf>, %130, %cst_46 [1] : vector<8x8xf32> to vector<8xf32>
    %132 = vector.shape_cast %131 : vector<8xf32> to vector<8x1xf32>
    %133 = vector.broadcast %132 : vector<8x1xf32> to vector<8x8xf32>
    %134 = arith.subf %130, %133 : vector<8x8xf32>
    %135 = math.exp %134 : vector<8x8xf32>
    %cst_47 = arith.constant dense<0.000000e+00> : vector<8xf32>
    %136 = vector.multi_reduction <add>, %135, %cst_47 [1] : vector<8x8xf32> to vector<8xf32>
    %137 = vector.shape_cast %136 : vector<8xf32> to vector<8x1xf32>
    %138 = tpu.reciprocal %137 {approx = true} : vector<8x1xf32> -> vector<8x1xf32>
    %139 = vector.broadcast %138 : vector<8x1xf32> to vector<8x8xf32>
    %140 = arith.mulf %135, %139 : vector<8x8xf32>
    %141 = arith.truncf %140 : vector<8x8xf32> to vector<8x8xbf16>
    %cst_48 = arith.constant dense<0.000000e+00> : vector<8x8xf32>
    %142 = tpu.matmul %141, %129, %cst_48 {dimension_numbers = #tpu.dot_dimension_numbers<[1], [0], [0], [1], [0, 0, 1, 1], [], []>} : vector<8x8xbf16>, vector<8x8xbf16>, vector<8x8xf32> -> vector<8x8xf32>
    %143 = arith.truncf %142 : vector<8x8xf32> to vector<8x8xbf16>
    %144 = arith.index_cast %c0_i32 : i32 to index
    %c3 = arith.constant 3 : index
    %c0_49 = arith.constant 0 : index
    %c0_50 = arith.constant 0 : index
    %145 = vector.load %arg9[%144, %c3, %c0_49, %c0_50] : memref<2x4x8x32xbf16, #tpu.memory_space<vmem>>, vector<1x1x8x32xbf16>
    %146 = vector.shape_cast %145 : vector<1x1x8x32xbf16> to vector<8x32xbf16>
    %cst_51 = arith.constant dense<0.000000e+00> : vector<8x32xf32>
    %147 = tpu.matmul %143, %146, %cst_51 {dimension_numbers = #tpu.dot_dimension_numbers<[1], [0], [0], [1], [0, 0, 1, 1], [], []>} : vector<8x8xbf16>, vector<8x32xbf16>, vector<8x32xf32> -> vector<8x32xf32>
    %148 = arith.addf %123, %147 : vector<8x32xf32>
    %149 = arith.addf %9, %148 : vector<8x32xf32>
    %150 = arith.index_cast %c0_i32 : i32 to index
    %c0_52 = arith.constant 0 : index
    %c0_53 = arith.constant 0 : index
    %151 = vector.load %arg10[%150, %c0_52, %c0_53] : memref<2x1x32xf32, #tpu.memory_space<vmem>>, vector<1x1x32xf32>
    %152 = vector.shape_cast %151 : vector<1x1x32xf32> to vector<1x32xf32>
    %153 = vector.broadcast %152 : vector<1x32xf32> to vector<8x32xf32>
    %154 = arith.addf %149, %153 : vector<8x32xf32>
    %155 = arith.index_cast %c0_i32 : i32 to index
    %c0_54 = arith.constant 0 : index
    %c0_55 = arith.constant 0 : index
    %156 = vector.load %arg11[%155, %c0_54, %c0_55] : memref<2x1x32xf32, #tpu.memory_space<vmem>>, vector<1x1x32xf32>
    %157 = vector.shape_cast %156 : vector<1x1x32xf32> to vector<1x32xf32>
    %158 = arith.index_cast %c0_i32 : i32 to index
    %c0_56 = arith.constant 0 : index
    %c0_57 = arith.constant 0 : index
    %159 = vector.load %arg12[%158, %c0_56, %c0_57] : memref<2x1x32xf32, #tpu.memory_space<vmem>>, vector<1x1x32xf32>
    %160 = vector.shape_cast %159 : vector<1x1x32xf32> to vector<1x32xf32>
    %cst_58 = arith.constant dense<0.000000e+00> : vector<8xf32>
    %161 = vector.multi_reduction <add>, %154, %cst_58 [1] : vector<8x32xf32> to vector<8xf32>
    %162 = vector.shape_cast %161 : vector<8xf32> to vector<8x1xf32>
    %cst_59 = arith.constant 3.200000e+01 : f32
    %163 = vector.broadcast %cst_59 : f32 to vector<8x1xf32>
    %164 = arith.divf %162, %163 : vector<8x1xf32>
    %165 = vector.broadcast %164 : vector<8x1xf32> to vector<8x32xf32>
    %166 = arith.subf %154, %165 : vector<8x32xf32>
    %167 = arith.mulf %166, %166 : vector<8x32xf32>
    %cst_60 = arith.constant dense<0.000000e+00> : vector<8xf32>
    %168 = vector.multi_reduction <add>, %167, %cst_60 [1] : vector<8x32xf32> to vector<8xf32>
    %169 = vector.shape_cast %168 : vector<8xf32> to vector<8x1xf32>
    %cst_61 = arith.constant 3.200000e+01 : f32
    %170 = vector.broadcast %cst_61 : f32 to vector<8x1xf32>
    %171 = arith.divf %169, %170 : vector<8x1xf32>
    %172 = vector.broadcast %164 : vector<8x1xf32> to vector<8x32xf32>
    %173 = arith.subf %154, %172 : vector<8x32xf32>
    %cst_62 = arith.constant 9.99999974E-6 : f32
    %174 = vector.broadcast %cst_62 : f32 to vector<8x1xf32>
    %175 = arith.addf %171, %174 : vector<8x1xf32>
    %176 = math.rsqrt %175 : vector<8x1xf32>
    %177 = vector.broadcast %176 : vector<8x1xf32> to vector<8x32xf32>
    %178 = arith.mulf %173, %177 : vector<8x32xf32>
    %179 = vector.broadcast %157 : vector<1x32xf32> to vector<8x32xf32>
    %180 = arith.mulf %178, %179 : vector<8x32xf32>
    %181 = vector.broadcast %160 : vector<1x32xf32> to vector<8x32xf32>
    %182 = arith.addf %180, %181 : vector<8x32xf32>
    %183 = arith.truncf %182 : vector<8x32xf32> to vector<8x32xbf16>
    %184 = arith.index_cast %c0_i32 : i32 to index
    %c0_63 = arith.constant 0 : index
    %c0_64 = arith.constant 0 : index
    %185 = vector.load %arg13[%184, %c0_63, %c0_64] : memref<2x32x128xbf16, #tpu.memory_space<vmem>>, vector<1x32x128xbf16>
    %186 = vector.shape_cast %185 : vector<1x32x128xbf16> to vector<32x128xbf16>
    %cst_65 = arith.constant dense<0.000000e+00> : vector<8x128xf32>
    %187 = tpu.matmul %183, %186, %cst_65 {dimension_numbers = #tpu.dot_dimension_numbers<[1], [0], [0], [1], [0, 0, 1, 1], [], []>} : vector<8x32xbf16>, vector<32x128xbf16>, vector<8x128xf32> -> vector<8x128xf32>
    %188 = arith.index_cast %c0_i32 : i32 to index
    %c0_66 = arith.constant 0 : index
    %c0_67 = arith.constant 0 : index
    %189 = vector.load %arg14[%188, %c0_66, %c0_67] : memref<2x1x128xf32, #tpu.memory_space<vmem>>, vector<1x1x128xf32>
    %190 = vector.shape_cast %189 : vector<1x1x128xf32> to vector<1x128xf32>
    %191 = vector.broadcast %190 : vector<1x128xf32> to vector<8x128xf32>
    %192 = arith.addf %187, %191 : vector<8x128xf32>
    %cst_68 = arith.constant 5.000000e-01 : f32
    %193 = vector.broadcast %cst_68 : f32 to vector<8x128xf32>
    %194 = arith.mulf %193, %192 : vector<8x128xf32>
    %cst_69 = arith.constant 0.707106769 : f32
    %195 = vector.broadcast %cst_69 : f32 to vector<8x128xf32>
    %196 = arith.mulf %192, %195 : vector<8x128xf32>
    %197 = math.erf %196 : vector<8x128xf32>
    %cst_70 = arith.constant 1.000000e+00 : f32
    %198 = vector.broadcast %cst_70 : f32 to vector<8x128xf32>
    %199 = arith.addf %198, %197 : vector<8x128xf32>
    %200 = arith.mulf %194, %199 : vector<8x128xf32>
    %201 = arith.truncf %200 : vector<8x128xf32> to vector<8x128xbf16>
    %202 = arith.index_cast %c0_i32 : i32 to index
    %c0_71 = arith.constant 0 : index
    %c0_72 = arith.constant 0 : index
    %203 = vector.load %arg15[%202, %c0_71, %c0_72] : memref<2x128x32xbf16, #tpu.memory_space<vmem>>, vector<1x128x32xbf16>
    %204 = vector.shape_cast %203 : vector<1x128x32xbf16> to vector<128x32xbf16>
    %cst_73 = arith.constant dense<0.000000e+00> : vector<8x32xf32>
    %205 = tpu.matmul %201, %204, %cst_73 {dimension_numbers = #tpu.dot_dimension_numbers<[1], [0], [0], [1], [0, 0, 1, 1], [], []>} : vector<8x128xbf16>, vector<128x32xbf16>, vector<8x32xf32> -> vector<8x32xf32>
    %206 = arith.index_cast %c0_i32 : i32 to index
    %c0_74 = arith.constant 0 : index
    %c0_75 = arith.constant 0 : index
    %207 = vector.load %arg16[%206, %c0_74, %c0_75] : memref<2x1x32xf32, #tpu.memory_space<vmem>>, vector<1x1x32xf32>
    %208 = vector.shape_cast %207 : vector<1x1x32xf32> to vector<1x32xf32>
    %209 = vector.broadcast %208 : vector<1x32xf32> to vector<8x32xf32>
    %210 = arith.addf %205, %209 : vector<8x32xf32>
    %211 = arith.addf %154, %210 : vector<8x32xf32>
    %c1_i32 = arith.constant 1 : i32
    %212 = arith.index_cast %c1_i32 : i32 to index
    %c0_76 = arith.constant 0 : index
    %c0_77 = arith.constant 0 : index
    %213 = vector.load %arg5[%212, %c0_76, %c0_77] : memref<2x1x32xf32, #tpu.memory_space<vmem>>, vector<1x1x32xf32>
    %214 = vector.shape_cast %213 : vector<1x1x32xf32> to vector<1x32xf32>
    %215 = arith.index_cast %c1_i32 : i32 to index
    %c0_78 = arith.constant 0 : index
    %c0_79 = arith.constant 0 : index
    %216 = vector.load %arg6[%215, %c0_78, %c0_79] : memref<2x1x32xf32, #tpu.memory_space<vmem>>, vector<1x1x32xf32>
    %217 = vector.shape_cast %216 : vector<1x1x32xf32> to vector<1x32xf32>
    %cst_80 = arith.constant dense<0.000000e+00> : vector<8xf32>
    %218 = vector.multi_reduction <add>, %211, %cst_80 [1] : vector<8x32xf32> to vector<8xf32>
    %219 = vector.shape_cast %218 : vector<8xf32> to vector<8x1xf32>
    %cst_81 = arith.constant 3.200000e+01 : f32
    %220 = vector.broadcast %cst_81 : f32 to vector<8x1xf32>
    %221 = arith.divf %219, %220 : vector<8x1xf32>
    %222 = vector.broadcast %221 : vector<8x1xf32> to vector<8x32xf32>
    %223 = arith.subf %211, %222 : vector<8x32xf32>
    %224 = arith.mulf %223, %223 : vector<8x32xf32>
    %cst_82 = arith.constant dense<0.000000e+00> : vector<8xf32>
    %225 = vector.multi_reduction <add>, %224, %cst_82 [1] : vector<8x32xf32> to vector<8xf32>
    %226 = vector.shape_cast %225 : vector<8xf32> to vector<8x1xf32>
    %cst_83 = arith.constant 3.200000e+01 : f32
    %227 = vector.broadcast %cst_83 : f32 to vector<8x1xf32>
    %228 = arith.divf %226, %227 : vector<8x1xf32>
    %229 = vector.broadcast %221 : vector<8x1xf32> to vector<8x32xf32>
    %230 = arith.subf %211, %229 : vector<8x32xf32>
    %cst_84 = arith.constant 9.99999974E-6 : f32
    %231 = vector.broadcast %cst_84 : f32 to vector<8x1xf32>
    %232 = arith.addf %228, %231 : vector<8x1xf32>
    %233 = math.rsqrt %232 : vector<8x1xf32>
    %234 = vector.broadcast %233 : vector<8x1xf32> to vector<8x32xf32>
    %235 = arith.mulf %230, %234 : vector<8x32xf32>
    %236 = vector.broadcast %214 : vector<1x32xf32> to vector<8x32xf32>
    %237 = arith.mulf %235, %236 : vector<8x32xf32>
    %238 = vector.broadcast %217 : vector<1x32xf32> to vector<8x32xf32>
    %239 = arith.addf %237, %238 : vector<8x32xf32>
    %240 = arith.truncf %239 : vector<8x32xf32> to vector<8x32xbf16>
    %241 = arith.index_cast %c1_i32 : i32 to index
    %c0_85 = arith.constant 0 : index
    %c0_86 = arith.constant 0 : index
    %242 = vector.load %arg7[%241, %c0_85, %c0_86] : memref<2x32x96xbf16, #tpu.memory_space<vmem>>, vector<1x32x96xbf16>
    %243 = vector.shape_cast %242 : vector<1x32x96xbf16> to vector<32x96xbf16>
    %cst_87 = arith.constant dense<0.000000e+00> : vector<8x96xf32>
    %244 = tpu.matmul %240, %243, %cst_87 {dimension_numbers = #tpu.dot_dimension_numbers<[1], [0], [0], [1], [0, 0, 1, 1], [], []>} : vector<8x32xbf16>, vector<32x96xbf16>, vector<8x96xf32> -> vector<8x96xf32>
    %245 = arith.index_cast %c1_i32 : i32 to index
    %c0_88 = arith.constant 0 : index
    %c0_89 = arith.constant 0 : index
    %246 = vector.load %arg8[%245, %c0_88, %c0_89] : memref<2x1x96xf32, #tpu.memory_space<vmem>>, vector<1x1x96xf32>
    %247 = vector.shape_cast %246 : vector<1x1x96xf32> to vector<1x96xf32>
    %248 = vector.broadcast %247 : vector<1x96xf32> to vector<8x96xf32>
    %249 = arith.addf %244, %248 : vector<8x96xf32>
    %cst_90 = arith.constant 0.000000e+00 : f32
    %250 = vector.broadcast %cst_90 : f32 to vector<8x32xf32>
    %251 = vector.extract_strided_slice %249 {offsets = [0, 0], sizes = [8, 8], strides = [1, 1]} : vector<8x96xf32> to vector<8x8xf32>
    %252 = arith.truncf %251 : vector<8x8xf32> to vector<8x8xbf16>
    %253 = vector.extract_strided_slice %249 {offsets = [0, 32], sizes = [8, 8], strides = [1, 1]} : vector<8x96xf32> to vector<8x8xf32>
    %254 = arith.truncf %253 : vector<8x8xf32> to vector<8x8xbf16>
    %255 = vector.extract_strided_slice %249 {offsets = [0, 64], sizes = [8, 8], strides = [1, 1]} : vector<8x96xf32> to vector<8x8xf32>
    %256 = arith.truncf %255 : vector<8x8xf32> to vector<8x8xbf16>
    "tpu.trace_start"() <{level = 10 : i32, message = "ne,me->nm"}> : () -> ()
    %cst_91 = arith.constant dense<0.000000e+00> : vector<8x8xf32>
    %257 = tpu.matmul %252, %254, %cst_91 {dimension_numbers = #tpu.dot_dimension_numbers<[1], [1], [0], [0], [0, 0, 1, 0], [], []>} : vector<8x8xbf16>, vector<8x8xbf16>, vector<8x8xf32> -> vector<8x8xf32>
    "tpu.trace_stop"() : () -> ()
    %cst_92 = arith.constant dense<0xFF800000> : vector<8xf32>
    %258 = vector.multi_reduction <maximumf>, %257, %cst_92 [1] : vector<8x8xf32> to vector<8xf32>
    %259 = vector.shape_cast %258 : vector<8xf32> to vector<8x1xf32>
    %260 = vector.broadcast %259 : vector<8x1xf32> to vector<8x8xf32>
    %261 = arith.subf %257, %260 : vector<8x8xf32>
    %262 = math.exp %261 : vector<8x8xf32>
    %cst_93 = arith.constant dense<0.000000e+00> : vector<8xf32>
    %263 = vector.multi_reduction <add>, %262, %cst_93 [1] : vector<8x8xf32> to vector<8xf32>
    %264 = vector.shape_cast %263 : vector<8xf32> to vector<8x1xf32>
    %265 = tpu.reciprocal %264 {approx = true} : vector<8x1xf32> -> vector<8x1xf32>
    %266 = vector.broadcast %265 : vector<8x1xf32> to vector<8x8xf32>
    %267 = arith.mulf %262, %266 : vector<8x8xf32>
    %268 = arith.truncf %267 : vector<8x8xf32> to vector<8x8xbf16>
    %cst_94 = arith.constant dense<0.000000e+00> : vector<8x8xf32>
    %269 = tpu.matmul %268, %256, %cst_94 {dimension_numbers = #tpu.dot_dimension_numbers<[1], [0], [0], [1], [0, 0, 1, 1], [], []>} : vector<8x8xbf16>, vector<8x8xbf16>, vector<8x8xf32> -> vector<8x8xf32>
    %270 = arith.truncf %269 : vector<8x8xf32> to vector<8x8xbf16>
    %271 = arith.index_cast %c1_i32 : i32 to index
    %c0_95 = arith.constant 0 : index
    %c0_96 = arith.constant 0 : index
    %c0_97 = arith.constant 0 : index
    %272 = vector.load %arg9[%271, %c0_95, %c0_96, %c0_97] : memref<2x4x8x32xbf16, #tpu.memory_space<vmem>>, vector<1x1x8x32xbf16>
    %273 = vector.shape_cast %272 : vector<1x1x8x32xbf16> to vector<8x32xbf16>
    %cst_98 = arith.constant dense<0.000000e+00> : vector<8x32xf32>
    %274 = tpu.matmul %270, %273, %cst_98 {dimension_numbers = #tpu.dot_dimension_numbers<[1], [0], [0], [1], [0, 0, 1, 1], [], []>} : vector<8x8xbf16>, vector<8x32xbf16>, vector<8x32xf32> -> vector<8x32xf32>
    %275 = arith.addf %250, %274 : vector<8x32xf32>
    %276 = vector.extract_strided_slice %249 {offsets = [0, 8], sizes = [8, 8], strides = [1, 1]} : vector<8x96xf32> to vector<8x8xf32>
    %277 = arith.truncf %276 : vector<8x8xf32> to vector<8x8xbf16>
    %278 = vector.extract_strided_slice %249 {offsets = [0, 40], sizes = [8, 8], strides = [1, 1]} : vector<8x96xf32> to vector<8x8xf32>
    %279 = arith.truncf %278 : vector<8x8xf32> to vector<8x8xbf16>
    %280 = vector.extract_strided_slice %249 {offsets = [0, 72], sizes = [8, 8], strides = [1, 1]} : vector<8x96xf32> to vector<8x8xf32>
    %281 = arith.truncf %280 : vector<8x8xf32> to vector<8x8xbf16>
    "tpu.trace_start"() <{level = 10 : i32, message = "ne,me->nm"}> : () -> ()
    %cst_99 = arith.constant dense<0.000000e+00> : vector<8x8xf32>
    %282 = tpu.matmul %277, %279, %cst_99 {dimension_numbers = #tpu.dot_dimension_numbers<[1], [1], [0], [0], [0, 0, 1, 0], [], []>} : vector<8x8xbf16>, vector<8x8xbf16>, vector<8x8xf32> -> vector<8x8xf32>
    "tpu.trace_stop"() : () -> ()
    %cst_100 = arith.constant dense<0xFF800000> : vector<8xf32>
    %283 = vector.multi_reduction <maximumf>, %282, %cst_100 [1] : vector<8x8xf32> to vector<8xf32>
    %284 = vector.shape_cast %283 : vector<8xf32> to vector<8x1xf32>
    %285 = vector.broadcast %284 : vector<8x1xf32> to vector<8x8xf32>
    %286 = arith.subf %282, %285 : vector<8x8xf32>
    %287 = math.exp %286 : vector<8x8xf32>
    %cst_101 = arith.constant dense<0.000000e+00> : vector<8xf32>
    %288 = vector.multi_reduction <add>, %287, %cst_101 [1] : vector<8x8xf32> to vector<8xf32>
    %289 = vector.shape_cast %288 : vector<8xf32> to vector<8x1xf32>
    %290 = tpu.reciprocal %289 {approx = true} : vector<8x1xf32> -> vector<8x1xf32>
    %291 = vector.broadcast %290 : vector<8x1xf32> to vector<8x8xf32>
    %292 = arith.mulf %287, %291 : vector<8x8xf32>
    %293 = arith.truncf %292 : vector<8x8xf32> to vector<8x8xbf16>
    %cst_102 = arith.constant dense<0.000000e+00> : vector<8x8xf32>
    %294 = tpu.matmul %293, %281, %cst_102 {dimension_numbers = #tpu.dot_dimension_numbers<[1], [0], [0], [1], [0, 0, 1, 1], [], []>} : vector<8x8xbf16>, vector<8x8xbf16>, vector<8x8xf32> -> vector<8x8xf32>
    %295 = arith.truncf %294 : vector<8x8xf32> to vector<8x8xbf16>
    %296 = arith.index_cast %c1_i32 : i32 to index
    %c1_103 = arith.constant 1 : index
    %c0_104 = arith.constant 0 : index
    %c0_105 = arith.constant 0 : index
    %297 = vector.load %arg9[%296, %c1_103, %c0_104, %c0_105] : memref<2x4x8x32xbf16, #tpu.memory_space<vmem>>, vector<1x1x8x32xbf16>
    %298 = vector.shape_cast %297 : vector<1x1x8x32xbf16> to vector<8x32xbf16>
    %cst_106 = arith.constant dense<0.000000e+00> : vector<8x32xf32>
    %299 = tpu.matmul %295, %298, %cst_106 {dimension_numbers = #tpu.dot_dimension_numbers<[1], [0], [0], [1], [0, 0, 1, 1], [], []>} : vector<8x8xbf16>, vector<8x32xbf16>, vector<8x32xf32> -> vector<8x32xf32>
    %300 = arith.addf %275, %299 : vector<8x32xf32>
    %301 = vector.extract_strided_slice %249 {offsets = [0, 16], sizes = [8, 8], strides = [1, 1]} : vector<8x96xf32> to vector<8x8xf32>
    %302 = arith.truncf %301 : vector<8x8xf32> to vector<8x8xbf16>
    %303 = vector.extract_strided_slice %249 {offsets = [0, 48], sizes = [8, 8], strides = [1, 1]} : vector<8x96xf32> to vector<8x8xf32>
    %304 = arith.truncf %303 : vector<8x8xf32> to vector<8x8xbf16>
    %305 = vector.extract_strided_slice %249 {offsets = [0, 80], sizes = [8, 8], strides = [1, 1]} : vector<8x96xf32> to vector<8x8xf32>
    %306 = arith.truncf %305 : vector<8x8xf32> to vector<8x8xbf16>
    "tpu.trace_start"() <{level = 10 : i32, message = "ne,me->nm"}> : () -> ()
    %cst_107 = arith.constant dense<0.000000e+00> : vector<8x8xf32>
    %307 = tpu.matmul %302, %304, %cst_107 {dimension_numbers = #tpu.dot_dimension_numbers<[1], [1], [0], [0], [0, 0, 1, 0], [], []>} : vector<8x8xbf16>, vector<8x8xbf16>, vector<8x8xf32> -> vector<8x8xf32>
    "tpu.trace_stop"() : () -> ()
    %cst_108 = arith.constant dense<0xFF800000> : vector<8xf32>
    %308 = vector.multi_reduction <maximumf>, %307, %cst_108 [1] : vector<8x8xf32> to vector<8xf32>
    %309 = vector.shape_cast %308 : vector<8xf32> to vector<8x1xf32>
    %310 = vector.broadcast %309 : vector<8x1xf32> to vector<8x8xf32>
    %311 = arith.subf %307, %310 : vector<8x8xf32>
    %312 = math.exp %311 : vector<8x8xf32>
    %cst_109 = arith.constant dense<0.000000e+00> : vector<8xf32>
    %313 = vector.multi_reduction <add>, %312, %cst_109 [1] : vector<8x8xf32> to vector<8xf32>
    %314 = vector.shape_cast %313 : vector<8xf32> to vector<8x1xf32>
    %315 = tpu.reciprocal %314 {approx = true} : vector<8x1xf32> -> vector<8x1xf32>
    %316 = vector.broadcast %315 : vector<8x1xf32> to vector<8x8xf32>
    %317 = arith.mulf %312, %316 : vector<8x8xf32>
    %318 = arith.truncf %317 : vector<8x8xf32> to vector<8x8xbf16>
    %cst_110 = arith.constant dense<0.000000e+00> : vector<8x8xf32>
    %319 = tpu.matmul %318, %306, %cst_110 {dimension_numbers = #tpu.dot_dimension_numbers<[1], [0], [0], [1], [0, 0, 1, 1], [], []>} : vector<8x8xbf16>, vector<8x8xbf16>, vector<8x8xf32> -> vector<8x8xf32>
    %320 = arith.truncf %319 : vector<8x8xf32> to vector<8x8xbf16>
    %321 = arith.index_cast %c1_i32 : i32 to index
    %c2_111 = arith.constant 2 : index
    %c0_112 = arith.constant 0 : index
    %c0_113 = arith.constant 0 : index
    %322 = vector.load %arg9[%321, %c2_111, %c0_112, %c0_113] : memref<2x4x8x32xbf16, #tpu.memory_space<vmem>>, vector<1x1x8x32xbf16>
    %323 = vector.shape_cast %322 : vector<1x1x8x32xbf16> to vector<8x32xbf16>
    %cst_114 = arith.constant dense<0.000000e+00> : vector<8x32xf32>
    %324 = tpu.matmul %320, %323, %cst_114 {dimension_numbers = #tpu.dot_dimension_numbers<[1], [0], [0], [1], [0, 0, 1, 1], [], []>} : vector<8x8xbf16>, vector<8x32xbf16>, vector<8x32xf32> -> vector<8x32xf32>
    %325 = arith.addf %300, %324 : vector<8x32xf32>
    %326 = vector.extract_strided_slice %249 {offsets = [0, 24], sizes = [8, 8], strides = [1, 1]} : vector<8x96xf32> to vector<8x8xf32>
    %327 = arith.truncf %326 : vector<8x8xf32> to vector<8x8xbf16>
    %328 = vector.extract_strided_slice %249 {offsets = [0, 56], sizes = [8, 8], strides = [1, 1]} : vector<8x96xf32> to vector<8x8xf32>
    %329 = arith.truncf %328 : vector<8x8xf32> to vector<8x8xbf16>
    %330 = vector.extract_strided_slice %249 {offsets = [0, 88], sizes = [8, 8], strides = [1, 1]} : vector<8x96xf32> to vector<8x8xf32>
    %331 = arith.truncf %330 : vector<8x8xf32> to vector<8x8xbf16>
    "tpu.trace_start"() <{level = 10 : i32, message = "ne,me->nm"}> : () -> ()
    %cst_115 = arith.constant dense<0.000000e+00> : vector<8x8xf32>
    %332 = tpu.matmul %327, %329, %cst_115 {dimension_numbers = #tpu.dot_dimension_numbers<[1], [1], [0], [0], [0, 0, 1, 0], [], []>} : vector<8x8xbf16>, vector<8x8xbf16>, vector<8x8xf32> -> vector<8x8xf32>
    "tpu.trace_stop"() : () -> ()
    %cst_116 = arith.constant dense<0xFF800000> : vector<8xf32>
    %333 = vector.multi_reduction <maximumf>, %332, %cst_116 [1] : vector<8x8xf32> to vector<8xf32>
    %334 = vector.shape_cast %333 : vector<8xf32> to vector<8x1xf32>
    %335 = vector.broadcast %334 : vector<8x1xf32> to vector<8x8xf32>
    %336 = arith.subf %332, %335 : vector<8x8xf32>
    %337 = math.exp %336 : vector<8x8xf32>
    %cst_117 = arith.constant dense<0.000000e+00> : vector<8xf32>
    %338 = vector.multi_reduction <add>, %337, %cst_117 [1] : vector<8x8xf32> to vector<8xf32>
    %339 = vector.shape_cast %338 : vector<8xf32> to vector<8x1xf32>
    %340 = tpu.reciprocal %339 {approx = true} : vector<8x1xf32> -> vector<8x1xf32>
    %341 = vector.broadcast %340 : vector<8x1xf32> to vector<8x8xf32>
    %342 = arith.mulf %337, %341 : vector<8x8xf32>
    %343 = arith.truncf %342 : vector<8x8xf32> to vector<8x8xbf16>
    %cst_118 = arith.constant dense<0.000000e+00> : vector<8x8xf32>
    %344 = tpu.matmul %343, %331, %cst_118 {dimension_numbers = #tpu.dot_dimension_numbers<[1], [0], [0], [1], [0, 0, 1, 1], [], []>} : vector<8x8xbf16>, vector<8x8xbf16>, vector<8x8xf32> -> vector<8x8xf32>
    %345 = arith.truncf %344 : vector<8x8xf32> to vector<8x8xbf16>
    %346 = arith.index_cast %c1_i32 : i32 to index
    %c3_119 = arith.constant 3 : index
    %c0_120 = arith.constant 0 : index
    %c0_121 = arith.constant 0 : index
    %347 = vector.load %arg9[%346, %c3_119, %c0_120, %c0_121] : memref<2x4x8x32xbf16, #tpu.memory_space<vmem>>, vector<1x1x8x32xbf16>
    %348 = vector.shape_cast %347 : vector<1x1x8x32xbf16> to vector<8x32xbf16>
    %cst_122 = arith.constant dense<0.000000e+00> : vector<8x32xf32>
    %349 = tpu.matmul %345, %348, %cst_122 {dimension_numbers = #tpu.dot_dimension_numbers<[1], [0], [0], [1], [0, 0, 1, 1], [], []>} : vector<8x8xbf16>, vector<8x32xbf16>, vector<8x32xf32> -> vector<8x32xf32>
    %350 = arith.addf %325, %349 : vector<8x32xf32>
    %351 = arith.addf %211, %350 : vector<8x32xf32>
    %352 = arith.index_cast %c1_i32 : i32 to index
    %c0_123 = arith.constant 0 : index
    %c0_124 = arith.constant 0 : index
    %353 = vector.load %arg10[%352, %c0_123, %c0_124] : memref<2x1x32xf32, #tpu.memory_space<vmem>>, vector<1x1x32xf32>
    %354 = vector.shape_cast %353 : vector<1x1x32xf32> to vector<1x32xf32>
    %355 = vector.broadcast %354 : vector<1x32xf32> to vector<8x32xf32>
    %356 = arith.addf %351, %355 : vector<8x32xf32>
    %357 = arith.index_cast %c1_i32 : i32 to index
    %c0_125 = arith.constant 0 : index
    %c0_126 = arith.constant 0 : index
    %358 = vector.load %arg11[%357, %c0_125, %c0_126] : memref<2x1x32xf32, #tpu.memory_space<vmem>>, vector<1x1x32xf32>
    %359 = vector.shape_cast %358 : vector<1x1x32xf32> to vector<1x32xf32>
    %360 = arith.index_cast %c1_i32 : i32 to index
    %c0_127 = arith.constant 0 : index
    %c0_128 = arith.constant 0 : index
    %361 = vector.load %arg12[%360, %c0_127, %c0_128] : memref<2x1x32xf32, #tpu.memory_space<vmem>>, vector<1x1x32xf32>
    %362 = vector.shape_cast %361 : vector<1x1x32xf32> to vector<1x32xf32>
    %cst_129 = arith.constant dense<0.000000e+00> : vector<8xf32>
    %363 = vector.multi_reduction <add>, %356, %cst_129 [1] : vector<8x32xf32> to vector<8xf32>
    %364 = vector.shape_cast %363 : vector<8xf32> to vector<8x1xf32>
    %cst_130 = arith.constant 3.200000e+01 : f32
    %365 = vector.broadcast %cst_130 : f32 to vector<8x1xf32>
    %366 = arith.divf %364, %365 : vector<8x1xf32>
    %367 = vector.broadcast %366 : vector<8x1xf32> to vector<8x32xf32>
    %368 = arith.subf %356, %367 : vector<8x32xf32>
    %369 = arith.mulf %368, %368 : vector<8x32xf32>
    %cst_131 = arith.constant dense<0.000000e+00> : vector<8xf32>
    %370 = vector.multi_reduction <add>, %369, %cst_131 [1] : vector<8x32xf32> to vector<8xf32>
    %371 = vector.shape_cast %370 : vector<8xf32> to vector<8x1xf32>
    %cst_132 = arith.constant 3.200000e+01 : f32
    %372 = vector.broadcast %cst_132 : f32 to vector<8x1xf32>
    %373 = arith.divf %371, %372 : vector<8x1xf32>
    %374 = vector.broadcast %366 : vector<8x1xf32> to vector<8x32xf32>
    %375 = arith.subf %356, %374 : vector<8x32xf32>
    %cst_133 = arith.constant 9.99999974E-6 : f32
    %376 = vector.broadcast %cst_133 : f32 to vector<8x1xf32>
    %377 = arith.addf %373, %376 : vector<8x1xf32>
    %378 = math.rsqrt %377 : vector<8x1xf32>
    %379 = vector.broadcast %378 : vector<8x1xf32> to vector<8x32xf32>
    %380 = arith.mulf %375, %379 : vector<8x32xf32>
    %381 = vector.broadcast %359 : vector<1x32xf32> to vector<8x32xf32>
    %382 = arith.mulf %380, %381 : vector<8x32xf32>
    %383 = vector.broadcast %362 : vector<1x32xf32> to vector<8x32xf32>
    %384 = arith.addf %382, %383 : vector<8x32xf32>
    %385 = arith.truncf %384 : vector<8x32xf32> to vector<8x32xbf16>
    %386 = arith.index_cast %c1_i32 : i32 to index
    %c0_134 = arith.constant 0 : index
    %c0_135 = arith.constant 0 : index
    %387 = vector.load %arg13[%386, %c0_134, %c0_135] : memref<2x32x128xbf16, #tpu.memory_space<vmem>>, vector<1x32x128xbf16>
    %388 = vector.shape_cast %387 : vector<1x32x128xbf16> to vector<32x128xbf16>
    %cst_136 = arith.constant dense<0.000000e+00> : vector<8x128xf32>
    %389 = tpu.matmul %385, %388, %cst_136 {dimension_numbers = #tpu.dot_dimension_numbers<[1], [0], [0], [1], [0, 0, 1, 1], [], []>} : vector<8x32xbf16>, vector<32x128xbf16>, vector<8x128xf32> -> vector<8x128xf32>
    %390 = arith.index_cast %c1_i32 : i32 to index
    %c0_137 = arith.constant 0 : index
    %c0_138 = arith.constant 0 : index
    %391 = vector.load %arg14[%390, %c0_137, %c0_138] : memref<2x1x128xf32, #tpu.memory_space<vmem>>, vector<1x1x128xf32>
    %392 = vector.shape_cast %391 : vector<1x1x128xf32> to vector<1x128xf32>
    %393 = vector.broadcast %392 : vector<1x128xf32> to vector<8x128xf32>
    %394 = arith.addf %389, %393 : vector<8x128xf32>
    %cst_139 = arith.constant 5.000000e-01 : f32
    %395 = vector.broadcast %cst_139 : f32 to vector<8x128xf32>
    %396 = arith.mulf %395, %394 : vector<8x128xf32>
    %cst_140 = arith.constant 0.707106769 : f32
    %397 = vector.broadcast %cst_140 : f32 to vector<8x128xf32>
    %398 = arith.mulf %394, %397 : vector<8x128xf32>
    %399 = math.erf %398 : vector<8x128xf32>
    %cst_141 = arith.constant 1.000000e+00 : f32
    %400 = vector.broadcast %cst_141 : f32 to vector<8x128xf32>
    %401 = arith.addf %400, %399 : vector<8x128xf32>
    %402 = arith.mulf %396, %401 : vector<8x128xf32>
    %403 = arith.truncf %402 : vector<8x128xf32> to vector<8x128xbf16>
    %404 = arith.index_cast %c1_i32 : i32 to index
    %c0_142 = arith.constant 0 : index
    %c0_143 = arith.constant 0 : index
    %405 = vector.load %arg15[%404, %c0_142, %c0_143] : memref<2x128x32xbf16, #tpu.memory_space<vmem>>, vector<1x128x32xbf16>
    %406 = vector.shape_cast %405 : vector<1x128x32xbf16> to vector<128x32xbf16>
    %cst_144 = arith.constant dense<0.000000e+00> : vector<8x32xf32>
    %407 = tpu.matmul %403, %406, %cst_144 {dimension_numbers = #tpu.dot_dimension_numbers<[1], [0], [0], [1], [0, 0, 1, 1], [], []>} : vector<8x128xbf16>, vector<128x32xbf16>, vector<8x32xf32> -> vector<8x32xf32>
    %408 = arith.index_cast %c1_i32 : i32 to index
    %c0_145 = arith.constant 0 : index
    %c0_146 = arith.constant 0 : index
    %409 = vector.load %arg16[%408, %c0_145, %c0_146] : memref<2x1x32xf32, #tpu.memory_space<vmem>>, vector<1x1x32xf32>
    %410 = vector.shape_cast %409 : vector<1x1x32xf32> to vector<1x32xf32>
    %411 = vector.broadcast %410 : vector<1x32xf32> to vector<8x32xf32>
    %412 = arith.addf %407, %411 : vector<8x32xf32>
    %413 = arith.addf %356, %412 : vector<8x32xf32>
    %c2_i32 = arith.constant 2 : i32
    %c0_147 = arith.constant 0 : index
    %c0_148 = arith.constant 0 : index
    %414 = vector.load %arg17[%c0_147, %c0_148] : memref<1x32xf32, #tpu.memory_space<vmem>>, vector<1x32xf32>
    %c0_149 = arith.constant 0 : index
    %c0_150 = arith.constant 0 : index
    %415 = vector.load %arg18[%c0_149, %c0_150] : memref<1x32xf32, #tpu.memory_space<vmem>>, vector<1x32xf32>
    %cst_151 = arith.constant dense<0.000000e+00> : vector<8xf32>
    %416 = vector.multi_reduction <add>, %413, %cst_151 [1] : vector<8x32xf32> to vector<8xf32>
    %417 = vector.shape_cast %416 : vector<8xf32> to vector<8x1xf32>
    %cst_152 = arith.constant 3.200000e+01 : f32
    %418 = vector.broadcast %cst_152 : f32 to vector<8x1xf32>
    %419 = arith.divf %417, %418 : vector<8x1xf32>
    %420 = vector.broadcast %419 : vector<8x1xf32> to vector<8x32xf32>
    %421 = arith.subf %413, %420 : vector<8x32xf32>
    %422 = arith.mulf %421, %421 : vector<8x32xf32>
    %cst_153 = arith.constant dense<0.000000e+00> : vector<8xf32>
    %423 = vector.multi_reduction <add>, %422, %cst_153 [1] : vector<8x32xf32> to vector<8xf32>
    %424 = vector.shape_cast %423 : vector<8xf32> to vector<8x1xf32>
    %cst_154 = arith.constant 3.200000e+01 : f32
    %425 = vector.broadcast %cst_154 : f32 to vector<8x1xf32>
    %426 = arith.divf %424, %425 : vector<8x1xf32>
    %427 = vector.broadcast %419 : vector<8x1xf32> to vector<8x32xf32>
    %428 = arith.subf %413, %427 : vector<8x32xf32>
    %cst_155 = arith.constant 9.99999974E-6 : f32
    %429 = vector.broadcast %cst_155 : f32 to vector<8x1xf32>
    %430 = arith.addf %426, %429 : vector<8x1xf32>
    %431 = math.rsqrt %430 : vector<8x1xf32>
    %432 = vector.broadcast %431 : vector<8x1xf32> to vector<8x32xf32>
    %433 = arith.mulf %428, %432 : vector<8x32xf32>
    %434 = vector.broadcast %414 : vector<1x32xf32> to vector<8x32xf32>
    %435 = arith.mulf %433, %434 : vector<8x32xf32>
    %436 = vector.broadcast %415 : vector<1x32xf32> to vector<8x32xf32>
    %437 = arith.addf %435, %436 : vector<8x32xf32>
    %438 = arith.truncf %437 : vector<8x32xf32> to vector<8x32xbf16>
    %c0_156 = arith.constant 0 : index
    %c0_157 = arith.constant 0 : index
    %439 = vector.load %arg19[%c0_156, %c0_157] : memref<32x32xbf16, #tpu.memory_space<vmem>>, vector<32x32xbf16>
    %cst_158 = arith.constant dense<0.000000e+00> : vector<8x32xf32>
    %440 = tpu.matmul %438, %439, %cst_158 {dimension_numbers = #tpu.dot_dimension_numbers<[1], [0], [0], [1], [0, 0, 1, 1], [], []>} : vector<8x32xbf16>, vector<32x32xbf16>, vector<8x32xf32> -> vector<8x32xf32>
    %c0_159 = arith.constant 0 : index
    %c0_160 = arith.constant 0 : index
    %441 = vector.load %arg20[%c0_159, %c0_160] : memref<1x32xf32, #tpu.memory_space<vmem>>, vector<1x32xf32>
    %442 = vector.broadcast %441 : vector<1x32xf32> to vector<8x32xf32>
    %443 = arith.addf %440, %442 : vector<8x32xf32>
    %c0_161 = arith.constant 0 : index
    %c0_162 = arith.constant 0 : index
    %c0_163 = arith.constant 0 : index
    %444 = vector.load %arg21[%c0_161, %c0_162, %c0_163] : memref<1x8x32xf32, #tpu.memory_space<vmem>>, vector<1x8x32xf32>
    %445 = vector.shape_cast %444 : vector<1x8x32xf32> to vector<8x32xf32>
    %446 = vector.shape_cast %443 : vector<8x32xf32> to vector<1x8x32xf32>
    tpu.vector_store %arg21[%c0_161, %c0_162, %c0_163], %446 {strides = array<i32>} : memref<1x8x32xf32, #tpu.memory_space<vmem>>, vector<1x8x32xf32>,
    return
  }
  func.func @transform_0(%arg0: i32) -> (i32, i32, i32) {
    %c0_i32 = arith.constant 0 : i32
    %c0_i32_0 = arith.constant 0 : i32
    %c0_i32_1 = arith.constant 0 : i32
    return %arg0, %c0_i32, %c0_i32_0 : i32, i32, i32
  }
  func.func @transform_1(%arg0: i32) -> (i32, i32) {
    %c0_i32 = arith.constant 0 : i32
    %c0_i32_0 = arith.constant 0 : i32
    %c0_i32_1 = arith.constant 0 : i32
    return %c0_i32, %c0_i32_0 : i32, i32
  }
  func.func @transform_2(%arg0: i32) -> (i32, i32) {
    %c0_i32 = arith.constant 0 : i32
    %c0_i32_0 = arith.constant 0 : i32
    %c0_i32_1 = arith.constant 0 : i32
    return %c0_i32, %c0_i32_0 : i32, i32
  }
  func.func @transform_3(%arg0: i32) -> (i32, i32) {
    %c0_i32 = arith.constant 0 : i32
    %c0_i32_0 = arith.constant 0 : i32
    %c0_i32_1 = arith.constant 0 : i32
    return %c0_i32, %c0_i32_0 : i32, i32
  }
  func.func @transform_4(%arg0: i32) -> (i32, i32, i32) {
    %c0_i32 = arith.constant 0 : i32
    %c0_i32_0 = arith.constant 0 : i32
    %c0_i32_1 = arith.constant 0 : i32
    %c0_i32_2 = arith.constant 0 : i32
    return %c0_i32, %c0_i32_0, %c0_i32_1 : i32, i32, i32
  }
  func.func @transform_5(%arg0: i32) -> (i32, i32, i32) {
    %c0_i32 = arith.constant 0 : i32
    %c0_i32_0 = arith.constant 0 : i32
    %c0_i32_1 = arith.constant 0 : i32
    %c0_i32_2 = arith.constant 0 : i32
    return %c0_i32, %c0_i32_0, %c0_i32_1 : i32, i32, i32
  }
  func.func @transform_6(%arg0: i32) -> (i32, i32, i32) {
    %c0_i32 = arith.constant 0 : i32
    %c0_i32_0 = arith.constant 0 : i32
    %c0_i32_1 = arith.constant 0 : i32
    %c0_i32_2 = arith.constant 0 : i32
    return %c0_i32, %c0_i32_0, %c0_i32_1 : i32, i32, i32
  }
  func.func @transform_7(%arg0: i32) -> (i32, i32, i32) {
    %c0_i32 = arith.constant 0 : i32
    %c0_i32_0 = arith.constant 0 : i32
    %c0_i32_1 = arith.constant 0 : i32
    %c0_i32_2 = arith.constant 0 : i32
    return %c0_i32, %c0_i32_0, %c0_i32_1 : i32, i32, i32
  }
  func.func @transform_8(%arg0: i32) -> (i32, i32, i32, i32) {
    %c0_i32 = arith.constant 0 : i32
    %c0_i32_0 = arith.constant 0 : i32
    %c0_i32_1 = arith.constant 0 : i32
    %c0_i32_2 = arith.constant 0 : i32
    %c0_i32_3 = arith.constant 0 : i32
    return %c0_i32, %c0_i32_0, %c0_i32_1, %c0_i32_2 : i32, i32, i32, i32
  }
  func.func @transform_9(%arg0: i32) -> (i32, i32, i32) {
    %c0_i32 = arith.constant 0 : i32
    %c0_i32_0 = arith.constant 0 : i32
    %c0_i32_1 = arith.constant 0 : i32
    %c0_i32_2 = arith.constant 0 : i32
    return %c0_i32, %c0_i32_0, %c0_i32_1 : i32, i32, i32
  }
  func.func @transform_10(%arg0: i32) -> (i32, i32, i32) {
    %c0_i32 = arith.constant 0 : i32
    %c0_i32_0 = arith.constant 0 : i32
    %c0_i32_1 = arith.constant 0 : i32
    %c0_i32_2 = arith.constant 0 : i32
    return %c0_i32, %c0_i32_0, %c0_i32_1 : i32, i32, i32
  }
  func.func @transform_11(%arg0: i32) -> (i32, i32, i32) {
    %c0_i32 = arith.constant 0 : i32
    %c0_i32_0 = arith.constant 0 : i32
    %c0_i32_1 = arith.constant 0 : i32
    %c0_i32_2 = arith.constant 0 : i32
    return %c0_i32, %c0_i32_0, %c0_i32_1 : i32, i32, i32
  }
  func.func @transform_12(%arg0: i32) -> (i32, i32, i32) {
    %c0_i32 = arith.constant 0 : i32
    %c0_i32_0 = arith.constant 0 : i32
    %c0_i32_1 = arith.constant 0 : i32
    %c0_i32_2 = arith.constant 0 : i32
    return %c0_i32, %c0_i32_0, %c0_i32_1 : i32, i32, i32
  }
  func.func @transform_13(%arg0: i32) -> (i32, i32, i32) {
    %c0_i32 = arith.constant 0 : i32
    %c0_i32_0 = arith.constant 0 : i32
    %c0_i32_1 = arith.constant 0 : i32
    %c0_i32_2 = arith.constant 0 : i32
    return %c0_i32, %c0_i32_0, %c0_i32_1 : i32, i32, i32
  }
  func.func @transform_14(%arg0: i32) -> (i32, i32, i32) {
    %c0_i32 = arith.constant 0 : i32
    %c0_i32_0 = arith.constant 0 : i32
    %c0_i32_1 = arith.constant 0 : i32
    %c0_i32_2 = arith.constant 0 : i32
    return %c0_i32, %c0_i32_0, %c0_i32_1 : i32, i32, i32
  }
  func.func @transform_15(%arg0: i32) -> (i32, i32, i32) {
    %c0_i32 = arith.constant 0 : i32
    %c0_i32_0 = arith.constant 0 : i32
    %c0_i32_1 = arith.constant 0 : i32
    %c0_i32_2 = arith.constant 0 : i32
    return %c0_i32, %c0_i32_0, %c0_i32_1 : i32, i32, i32
  }
  func.func @transform_16(%arg0: i32) -> (i32, i32) {
    %c0_i32 = arith.constant 0 : i32
    %c0_i32_0 = arith.constant 0 : i32
    %c0_i32_1 = arith.constant 0 : i32
    return %c0_i32, %c0_i32_0 : i32, i32
  }
  func.func @transform_17(%arg0: i32) -> (i32, i32) {
    %c0_i32 = arith.constant 0 : i32
    %c0_i32_0 = arith.constant 0 : i32
    %c0_i32_1 = arith.constant 0 : i32
    return %c0_i32, %c0_i32_0 : i32, i32
  }
  func.func @transform_18(%arg0: i32) -> (i32, i32) {
    %c0_i32 = arith.constant 0 : i32
    %c0_i32_0 = arith.constant 0 : i32
    %c0_i32_1 = arith.constant 0 : i32
    return %c0_i32, %c0_i32_0 : i32, i32
  }
  func.func @transform_19(%arg0: i32) -> (i32, i32) {
    %c0_i32 = arith.constant 0 : i32
    %c0_i32_0 = arith.constant 0 : i32
    %c0_i32_1 = arith.constant 0 : i32
    return %c0_i32, %c0_i32_0 : i32, i32
  }
  func.func @transform_20(%arg0: i32) -> (i32, i32, i32) {
    %c0_i32 = arith.constant 0 : i32
    %c0_i32_0 = arith.constant 0 : i32
    %c0_i32_1 = arith.constant 0 : i32
    return %arg0, %c0_i32, %c0_i32_0 : i32, i32, i32
  }
}

</mosaic_0001>

<bundles_post_ra>
// kernel: tpu_custom_call.1
= control target key start
LH: loop header
LB: loop body
LE: loop exit
PB: predicated region body
PF: predicated region fallthrough
CT: control target
= control target key end

     0   :  { %s2947_s0 = inlined_call_operand.vmem [shape: f32[2,8,32], index: 0, kind: input, shape index: {}]   ;;  %s2948_s1 = inlined_call_operand.vmem [shape: f32[8,32], index: 1, kind: input, shape index: {}]   ;;  %s2949_s2 = inlined_call_operand.vmem [shape: bf16[32,32], index: 2, kind: input, shape index: {}]   ;;  %s2950_s3 = inlined_call_operand.vmem [shape: f32[1,32], index: 3, kind: input, shape index: {}]   ;;  %s2951_s4 = inlined_call_operand.vmem [shape: f32[2,1,32], index: 4, kind: input, shape index: {}]   ;;  %s2952_s5 = inlined_call_operand.vmem [shape: f32[2,1,32], index: 5, kind: input, shape index: {}]   ;;  %s2953_s6 = inlined_call_operand.vmem [shape: bf16[2,32,96], index: 6, kind: input, shape index: {}]   ;;  %s2954_s7 = inlined_call_operand.vmem [shape: f32[2,1,96], index: 7, kind: input, shape index: {}]   ;;  %s2955_s8 = inlined_call_operand.vmem [shape: bf16[2,4,8,32], index: 8, kind: input, shape index: {}]   ;;  %s2956_s9 = inlined_call_operand.vmem [shape: f32[2,1,32], index: 9, kind: input, shape index: {}]   ;;  %s2957_s10 = inlined_call_operand.vmem [shape: f32[2,1,32], index: 10, kind: input, shape index: {}]   ;;  %s2958_s11 = inlined_call_operand.vmem [shape: f32[2,1,32], index: 11, kind: input, shape index: {}]   ;;  %s2959_s12 = inlined_call_operand.vmem [shape: bf16[2,32,128], index: 12, kind: input, shape index: {}]   ;;  %s2960_s13 = inlined_call_operand.vmem [shape: f32[2,1,128], index: 13, kind: input, shape index: {}]   ;;  %s2961_s14 = inlined_call_operand.vmem [shape: bf16[2,128,32], index: 14, kind: input, shape index: {}]   ;;  %s2962_s15 = inlined_call_operand.vmem [shape: f32[2,1,32], index: 15, kind: input, shape index: {}]   ;;  %s2963_s16 = inlined_call_operand.vmem [shape: f32[1,32], index: 16, kind: input, shape index: {}]   ;;  %s2964_s17 = inlined_call_operand.vmem [shape: f32[1,32], index: 17, kind: input, shape index: {}]   ;;  %s2965_s18 = inlined_call_operand.vmem [shape: bf16[32,32], index: 18, kind: input, shape index: {}]   ;;  %s2966_s19 = inlined_call_operand.vmem [shape: f32[1,32], index: 19, kind: input, shape index: {}]   ;;  %s2967_s20 = inlined_call_operand.hbm [shape: f32[2,8,32], index: 20, kind: output, shape index: {}]  }
   0x1   :  { %2984 = sst [smem:[#allocation11_spill]] %s2947_s0 }
   0x2   :  { %2985 = sst [smem:[#allocation12_spill]] %s2948_s1 }
   0x3   :  { %2986 = sst [smem:[#allocation13_spill]] %s2949_s2 }
   0x4   :  { %2987 = sst [smem:[#allocation14_spill]] %s2950_s3 }
   0x5   :  { %2988 = sst [smem:[#allocation15_spill]] %s2951_s4 }
   0x6   :  { %2989 = sst [smem:[#allocation16_spill]] %s2952_s5 }
   0x7   :  { %2990 = sst [smem:[#allocation17_spill]] %s2953_s6 }
   0x8   :  { %2991 = sst [smem:[#allocation18_spill]] %s2954_s7 }
   0x9   :  { %2992 = sst [smem:[#allocation19_spill]] %s2966_s19 }
   0xa   :  { %25 = vsyncpa [#allocation3], 0 }
   0xb   :  { %27 = vsyncpa [#allocation3 + $0x1], 0  ;;  %s2522_s1 = smov 0   ;;  %s2524_s22 = smov 0  }
   0xc   :  { %s2526_s23 = smov 0   ;;  %s2528_s24 = smov 0  }
   0xd LB: > { %2993 = sst [smem:[#allocation5_spill]] %s2391_s1  ;;  %s2543_s2 = sadd.s32 4294967295, %s2403_s24   ;;  %s2403_s24 = sphi %s2528_s24, %s3021_s24   ;;  %s2399_s23 = sphi %s2526_s23, %s3023_s23   ;;  %s2395_s22 = sphi %s2524_s22, %s3025_s22   ;;  %s2391_s1 = sphi %s2522_s1, %s3024_s1  }
   0xe   : > { %2994 = sst [smem:[#allocation6_spill]] %s2399_s23  ;;  %s2001_s25 = sadd.s32 4294967294, %s2403_s24  }
   0xf   : > { %2995 = sst [smem:[#allocation7_spill]] %s2403_s24  ;;  %s2547_s3 = sadd.s32 1, %s2403_s24  }
  0x10   : > { %2996 = sst [smem:[#allocation8_spill]] %s2547_s3  ;;  %s465_s26 = sadd.s32 1, %s2399_s23 }
  0x11   : > { %s462_s27 = ssub.s32 %s2403_s24, %s2547_s3  ;;  %p475_p0 = scmp.ne.s32.totalorder %s2399_s23, %s2395_s22 }
  0x12   : > { %p463_p1 = scmp.eq.s32.totalorder %s462_s27, 0  ;;  %p476_p2 = scmp.eq.s32.totalorder %s2543_s2, 1 }
  0x13   : > { %p481_p3 = scmp.ne.s32.totalorder %s2395_s22, %s2391_s1  ;;  %p482_p4 = scmp.eq.s32.totalorder %s2001_s25, 1 }
  0x14   : > { %s2558_s28 = scalar_select %p463_p1, %s2399_s23, %s465_s26  }
  0x15   : > { %p2560_p5 = por %p476_p2, %p475_p0  ;;  %p2564_p6 = por %p482_p4, %p481_p3 }
  0x16   : > { %2997 = sst [smem:[#allocation9_spill]] %s2558_s28  ;;  %p2004_p7 = scmp.ge.s32.totalorder %s2403_s24, 1 }
  0x17   : > { %s2999_s29 = scalar_select %p2564_p6, 1, 0 }
  0x18   : > { %p564_p8 = scmp.lt.s32.totalorder %s2403_s24, 3 }
  0x19   : > { %3000 = sst [smem:[#allocation10_spill]] %s2999_s29 }
  0x1a   : > { %p565_p9 = pnand %p2004_p7, %p564_p8 }
  0x1b   : > { %s3001_s21 = sld [smem:[#allocation13_spill]] (!%p565_p9)  ;;  %p621_p10 = scmp.lt.s32.totalorder (!%p565_p9), %s2543_s2, 1 }
  0x1c   : > { %568 = sbr.rel (%p565_p9) target bundleno = 5181 (0x143d), region = 100  ;;  %s3002_s29 = sld [smem:[#allocation11_spill]] (!%p565_p9) }
  0x1d   : > { %s3003_s24 = sld [smem:[#allocation14_spill]] (!%p565_p9)  ;;  %s2407_s19 = smov (!%p565_p9), 96  }
  0x1e   : > { %s3004_s26 = sld [smem:[#allocation12_spill]] (!%p565_p9)  ;;  %s2979_s23 = smov (!%p565_p9), 104  }
  0x1f   : > { %s3005_s6 = sld [smem:[#allocation17_spill]] (!%p565_p9)  ;;  %s2983_s30 = smov (!%p565_p9), 80  }
  0x20   : > { %s3007_s5 = sld [smem:[#allocation16_spill]] (!%p565_p9)  ;;  %s2981_s0 = smov (!%p565_p9), 112  }
  0x21   : > { %v2195_v0 = vld [vmem:[%s3001_s21 + $0x8] sm:$0xff]  ;;  %v2194_v1 = vld [vmem:[%s3001_s21] sm:$0xff]  ;;  %s622_s27 = scalar_select %p621_p10, %s2543_s2, 1  ;;  %vm648_vm0 = vcmask 261120   ;;  %v2405_v11 = vmov 32.0   ;;  %vm784_vm5 = vcmask 1043456  }
  0x22   : > { %658 = vmatpush.bf16.msra.mxu0 %v2195_v0  ;;  %2293 = vrcp.f32 %v2405_v11  ;;  %s3008_s7 = sld [smem:[#allocation18_spill]]  ;;  %v802_v46 = vld [vmem:[%s2955_s8] sm:$0xf]  ;;  %vm747_vm6 = vcmask 64512   ;;  %s2976_s25 = smov 40  }
  0x23   : > { %s2006_s28 = sshll.u32 %s622_s27, 3  ;;  %v2273_v4 = vld [vmem:[%s3003_s24] ss:$0 sm:$0xff]  ;;  %v885_v49 = vsel %vm784_vm5, %v802_v46, 0  ;;  %s2411_s27 = smov 120  }
  0x24   : > { %s624_s1 = scalar_lea.vmem %s3002_s29, %s2006_s28  ;;  %v665_v6 = vld [vmem:[%s3004_s26] sm:$0xff]  ;;  %s3006_s29 = sld [smem:[#allocation15_spill]] }
  0x25   : > { %v626_v2 = vld [vmem:[%s624_s1] sm:$0xff]  ;;  %v2197_v23 = vld [vmem:[%s3005_s6 + $0x8] sm:$0xff]  ;;  %s2980_s26 = smov 88   ;;  %s2408_s1 = smov 72  }
  0x26   : > { %659 = vmatpush.bf16.msra.mxu0 %v2194_v1  ;;  %v627_v3 = vpack.c.bf16 %v626_v2, %v626_v2  ;;  %736 = vmatpush.bf16.msra.mxu1 %v2197_v23  ;;  %v2196_v24 = vld [vmem:[%s3005_s6] sm:$0xff]  ;;  %s2982_s28 = smov 64   ;;  %s2978_s24 = smov 56  }
  0x27   : > { %v2275_v37 = vld [vmem:[%s3007_s5] ss:$0 sm:$0xff]  ;;  %s2977_s3 = smov 48  }
  0x28   : > { %v2294_v12 = vpop.eup %2293  ;;  %v2276_v41 = vld [vmem:[%s3008_s7] ss:$0 sm:$0xff] }
  0x29   : > { %2015 = vmatmul.msk.bf16.vlgmr.msra.gmra.mxu0 %vm648_vm0, %v627_v3  ;;  %v673_v13 = vmul.f32 32.0, %v2294_v12  ;;  %vm677_vm1 = vweird.f32 %v2294_v12 }
  0x2a   : > { %737 = vmatpush.bf16.msra.mxu1 %v2196_v24  ;;  %v2274_v34 = vld [vmem:[%s3006_s29] ss:$0 sm:$0xff] }
  0x2b   : > { %v674_v14 = vsub.f32 1.0, %v673_v13 }
  0x2d   : > { %v675_v15 = vmul.f32 %v2294_v12, %v674_v14 }
  0x2f   : > { %v676_v16 = vadd.f32 %v2294_v12, %v675_v15 }
  0x31   : > { %v2592_v17 = vsel %vm677_vm1, %v2294_v12, %v676_v16 }
  0xa6   : > { %v661_v5 = vpop.f32.mrf.mxu0 }
  0xa7   : > { %v662_v7 = vadd.f32 %v2273_v4, %v661_v5 }
  0xa9   : > { %v2588_v8 = vadd.f32 %v665_v6, %v662_v7 }
  0xab   : > { %v669_v9 = vsel %vm648_vm0, %v2588_v8, 0.0 }
  0xac   : > { %670 = vadd.xlane.f32.xlu0 %v669_v9 }
  0xae   : > { %v663_v10 = vpop.f32.mrf.mxu0 }
 0x11f   : > { %v671_v18 = vpop.xlane.xlu0 %670 }
 0x120   : > { %v679_v19 = vmul.f32 %v2592_v17, %v671_v18 }
 0x122   : > { %v680_v20 = vsub.f32 %v2588_v8, %v679_v19 }
 0x124   : > { %v681_v21 = vmul.f32 %v680_v20, %v680_v20 }
 0x126   : > { %v682_v22 = vsel %vm648_vm0, %v681_v21, 0.0 }
 0x127   : > { %683 = vadd.xlane.f32.xlu0 %v682_v22 }
 0x19a   : > { %v684_v25 = vpop.xlane.xlu0 %683 }
 0x19b   : > { %v685_v26 = vmul.f32 %v684_v25, %v2592_v17 }
 0x19d   : > { %v686_v27 = vadd.f32 1e-05, %v685_v26 }
 0x19f   : > { %2295 = vrsqrt.f32 %v686_v27  ;;  %vm693_vm3 = vweird.f32 %v686_v27 }
 0x1a5   : > { %v2296_v28 = vpop.eup %2295 }
 0x1a6   : > { %v688_v29 = vmul.f32 %v2296_v28, %v686_v27  ;;  %vm694_vm2 = vweird.f32 %v2296_v28 }
 0x1a7   : > { %vm695_vm4 = vmor %vm693_vm3, %vm694_vm2 }
 0x1a8   : > { %v689_v30 = vmul.f32 %v2296_v28, %v688_v29 }
 0x1aa   : > { %v690_v31 = vmul.f32 0.5, %v689_v30 }
 0x1ac   : > { %v691_v32 = vsub.f32 1.5, %v690_v31 }
 0x1ae   : > { %v692_v33 = vmul.f32 %v2296_v28, %v691_v32 }
 0x1b0   : > { %v696_v35 = vsel %vm695_vm4, %v2296_v28, %v692_v33 }
 0x1b1   : > { %v697_v36 = vmul.f32 %v696_v35, %v680_v20 }
 0x1b3   : > { %v701_v38 = vmul.f32 %v2274_v34, %v697_v36 }
 0x1b5   : > { %v705_v39 = vadd.f32 %v2275_v37, %v701_v38 }
 0x1b7   : > { %v706_v40 = vpack.c.bf16 %v705_v39, %v705_v39 }
 0x1b9   : > { %2024 = vmatmul.msk.bf16.vlgmr.msra.gmra.mxu1 %vm648_vm0, %v706_v40 }
 0x236   : > { %v739_v42 = vpop.f32.mrf.mxu1 }
 0x237   : > { %v740_v43 = vadd.f32 %v2276_v41, %v739_v42 }
 0x239   : > { %v2614_v44 = vpack.c.bf16 %v740_v43, %v740_v43 }
 0x23b   : > { %805 = vrot.lane.b32.xlu0 %v2614_v44, %s2980_s26  ;;  %745 = vrot.lane.b32.xlu1 %v2614_v44, %s2407_s19 }
 0x23e   : > { %v741_v45 = vpop.f32.mrf.mxu1 }
 0x243   : > { %981 = vrot.lane.b32.xlu0 %v2614_v44, %s2408_s1 }
 0x24b   : > { %979 = vrot.lane.b32.xlu0 %v2614_v44, %s2979_s23  ;;  %s3016_s23 = smov 40  }
 0x2ad   : > { %v806_v47 = vpop.permute.xlu0 %805  ;;  %v746_v48 = vpop.permute.xlu1 %745 }
 0x2ae   : > { %v752_v50 = vsel %vm747_vm6, %v746_v48, 0  ;;  %v811_v2 = vsel %vm747_vm6, %v806_v47, 0 }
 0x2af   : > { %761 = vmatpush.bf16.xpose.msra.mxu2 %v752_v50 }
 0x2b5   : > { %v982_v51 = vpop.permute.xlu0 %981 }
 0x2b6   : > { %v987_v52 = vsel %vm747_vm6, %v982_v51, 0  ;;  %2025 = vmatmul.msk.bf16.vlgmr.msra.gmra.mxu2 %vm747_vm6, %v2614_v44 }
 0x2b7   : > { %894 = vmatpush.bf16.msrb.mxu2 %v885_v49 }
 0x2bb   : > { %996 = vmatpush.bf16.xpose.msra.mxu2 %v987_v52 }
 0x2bd   : > { %v980_v14 = vpop.permute.xlu0 %979 }
 0x339   : > { %v763_v53 = vpop.f32.mrf.mxu2 }
 0x33a   : > { %v767_v54 = vsel %vm747_vm6, %v763_v53, -inf }
 0x33b   : > { %768 = vmax.xlane.f32.xlu1 %v767_v54  ;;  %v2029_v54 = vld [vmem:[%s2955_s8 + $0x4] sm:$0xf] }
 0x341   : > { %v765_v55 = vpop.f32.mrf.mxu2 }
 0x342   : > { %v866_v55 = vsel %vm784_vm5, %v2029_v54, 0 }
 0x343   : > { %875 = vmatpush.bf16.msrb.mxu1 %v866_v55 }
 0x3ae   : > { %v769_v56 = vpop.xlane.xlu1 %768 }
 0x3af   : > { %v770_v57 = vsub.f32 %v763_v53, %v769_v56 }
 0x3b1   : > { %v771_v58 = vmul.f32 1.442695, %v770_v57  ;;  %v2034_v57 = vld [vmem:[%s2955_s8 + $0x8] sm:$0xf] }
 0x3b3   : > { %2297 = vpow2.f32 %v771_v58  ;;  %v963_v58 = vsel %vm784_vm5, %v2034_v57, 0  ;;  %v2203_v57 = vld [vmem:[%s2961_s14 + $0x18] sm:$0xff] }
 0x3b4   : > { %972 = vmatpush.bf16.msra.mxu1 %v963_v58 }
 0x3b9   : > { %v2298_v59 = vpop.eup %2297 }
 0x3ba   : > { %v773_v60 = vsel %vm747_vm6, %v2298_v59, 0.0 }
 0x3bb   : > { %774 = vadd.xlane.f32.xlu2 %v773_v60 }
 0x3d3   : > { %779 = vrot.lane.b32.xlu2 %v2614_v44, %s2982_s28  ;;  %s3014_s28 = smov 56  }
 0x3db   : > { %803 = vrot.lane.b32.xlu2 %v2614_v44, %s2411_s27 }
 0x3e3   : > { %902 = vrot.lane.b32.xlu2 %v2614_v44, %s2983_s30  ;;  %s3015_s30 = smov 48  }
 0x3eb   : > { %900 = vrot.lane.b32.xlu2 %v2614_v44, %s2981_s0  ;;  %s3013_s0 = smov 104  }
 0x42e   : > { %v775_v61 = vpop.xlane.xlu2 %774 }
 0x42f   : > { %2299 = vrcp.f32 %v775_v61 }
 0x435   : > { %v2300_v62 = vpop.eup %2299 }
 0x436   : > { %v780_v63 = vpop.permute.xlu2 %779  ;;  %v777_v0 = vmul.f32 %v2300_v62, %v2298_v59 }
 0x437   : > { %v786_v1 = vsel %vm784_vm5, %v780_v63, 0 }
 0x438   : > { %795 = vmatpush.bf16.msra.mxu3 %v786_v1  ;;  %v778_v3 = vpack.c.bf16 %v777_v0, %v777_v0 }
 0x43b   : > { %2026 = vmatmul.msk.bf16.vlgmr.msra.gmra.mxu3 %vm747_vm6, %v778_v3 }
 0x43c   : > { %820 = vmatpush.bf16.xpose.msrb.mxu3 %v811_v2 }
 0x43e   : > { %v804_v4 = vpop.permute.xlu2 %803 }
 0x446   : > { %v903_v5 = vpop.permute.xlu2 %902 }
 0x447   : > { %v908_v6 = vsel %vm747_vm6, %v903_v5, 0 }
 0x448   : > { %917 = vmatpush.bf16.xpose.msra.mxu3 %v908_v6 }
 0x44b   : > { %2027 = vmatmul.msk.bf16.vlgmr.msrb.gmra.mxu3 %vm747_vm6, %v804_v4  ;;  %v2038_v4 = vld [vmem:[%s2955_s8 + $0xc] sm:$0xf] }
 0x44c   : > { %v1042_v5 = vsel %vm784_vm5, %v2038_v4, 0 }
 0x44e   : > { %v901_v7 = vpop.permute.xlu2 %900 }
 0x45b   : > { %2032 = vmatmul.msk.bf16.vlgmr.msra.gmra.mxu3 %vm747_vm6, %v901_v7 }
 0x4be   : > { %v797_v9 = vpop.f32.mrf.mxu3 }
 0x4bf   : > { %v801_v10 = vpack.c.bf16 %v797_v9, %v797_v9 }
 0x4c1   : > { %2031 = vmatmul.msk.bf16.vlgmr.msrb.gmra.mxu2 %vm747_vm6, %v801_v10 }
 0x4c6   : > { %v799_v11 = vpop.f32.mrf.mxu3 }
 0x4ce   : > { %v822_v12 = vpop.f32.mrf.mxu3 }
 0x4cf   : > { %v826_v13 = vsel %vm747_vm6, %v822_v12, -inf }
 0x4d0   : > { %827 = vmax.xlane.f32.xlu1 %v826_v13 }
 0x4d1   : > { %2036 = vmatmul.msk.bf16.vlgmr.msra.gmra.mxu2 %vm747_vm6, %v980_v14 }
 0x4d6   : > { %v824_v15 = vpop.f32.mrf.mxu3 }
 0x4de   : > { %v919_v16 = vpop.f32.mrf.mxu3 }
 0x4df   : > { %v923_v18 = vsel %vm747_vm6, %v919_v16, -inf }
 0x4e0   : > { %924 = vmax.xlane.f32.xlu2 %v923_v18 }
 0x4e6   : > { %v921_v19 = vpop.f32.mrf.mxu3 }
 0x4e7   : > { %v2277_v19 = vld [vmem:[%s2956_s9] ss:$0 sm:$0xff] }
 0x4f8   : > { %1014 = vrot.lane.b32.xlu2 %v2614_v44, %s2976_s25  ;;  %s618_s25 = sand.u32 1, %s2395_s22  }
 0x543   : > { %v828_v20 = vpop.xlane.xlu1 %827 }
 0x544   : > { %v829_v21 = vsub.f32 %v822_v12, %v828_v20  ;;  %v2654_v22 = vpop.f32.mrf.mxu2 }
 0x546   : > { %v830_v23 = vmul.f32 1.442695, %v829_v21 }
 0x548   : > { %2301 = vpow2.f32 %v830_v23 }
 0x54c   : > { %v898_v24 = vpop.f32.mrf.mxu2 }
 0x54e   : > { %v2302_v25 = vpop.eup %2301 }
 0x54f   : > { %v832_v26 = vsel %vm747_vm6, %v2302_v25, 0.0 }
 0x550   : > { %833 = vadd.xlane.f32.xlu1 %v832_v26 }
 0x553   : > { %v925_v27 = vpop.xlane.xlu2 %924 }
 0x554   : > { %v926_v28 = vsub.f32 %v919_v16, %v925_v27  ;;  %v998_v29 = vpop.f32.mrf.mxu2 }
 0x555   : > { %v1002_v30 = vsel %vm747_vm6, %v998_v29, -inf }
 0x556   : > { %v927_v31 = vmul.f32 1.442695, %v926_v28  ;;  %1003 = vmax.xlane.f32.xlu0 %v1002_v30 }
 0x558   : > { %2303 = vpow2.f32 %v927_v31 }
 0x55b   : > { %v1015_v32 = vpop.permute.xlu2 %1014 }
 0x55c   : > { %v1020_v33 = vsel %vm784_vm5, %v1015_v32, 0  ;;  %v1000_v34 = vpop.f32.mrf.mxu2 }
 0x55d   : > { %1029 = vmatpush.bf16.msrb.mxu3 %v1020_v33 }
 0x55e   : > { %v2304_v35 = vpop.eup %2303 }
 0x55f   : > { %v929_v36 = vsel %vm747_vm6, %v2304_v35, 0.0 }
 0x560   : > { %930 = vadd.xlane.f32.xlu0 %v929_v36 }
 0x569   : > { %838 = vrot.lane.b32.xlu1 %v2614_v44, %s2978_s24  ;;  %s3009_s24 = smov 80  }
 0x574   : > { %935 = vrot.lane.b32.xlu0 %v2614_v44, %s2977_s3  ;;  %s2005_s3 = sshll.u32 %s618_s25, 3 }
 0x5c3   : > { %v834_v40 = vpop.xlane.xlu1 %833 }
 0x5c9   : > { %v1004_v37 = vpop.xlane.xlu0 %1003 }
 0x5ca   : > { %v1005_v38 = vsub.f32 %v998_v29, %v1004_v37  ;;  %v2198_v29 = vld [vmem:[%s2959_s12] sm:$0xff] }
 0x5cc   : > { %v1006_v39 = vmul.f32 1.442695, %v1005_v38 }
 0x5ce   : > { %2305 = vpow2.f32 %v1006_v39  ;;  %v2278_v39 = vld [vmem:[%s2957_s10] ss:$0 sm:$0xff] }
 0x5cf   : > { %2307 = vrcp.f32 %v834_v40 }
 0x5d3   : > { %v931_v48 = vpop.xlane.xlu0 %930 }
 0x5d4   : > { %v2306_v41 = vpop.eup %2305  ;;  %2309 = vrcp.f32 %v931_v48  ;;  %v2206_v48 = vld [vmem:[%s2961_s14 + $0x30] sm:$0xff] }
 0x5d5   : > { %v1008_v42 = vsel %vm747_vm6, %v2306_v41, 0.0  ;;  %v2308_v43 = vpop.eup %2307 }
 0x5d6   : > { %1009 = vadd.xlane.f32.xlu1 %v1008_v42  ;;  %v836_v45 = vmul.f32 %v2308_v43, %v2302_v25  ;;  %v2279_v42 = vld [vmem:[%s2958_s11] ss:$0 sm:$0xff] }
 0x5d8   : > { %v837_v49 = vpack.c.bf16 %v836_v45, %v836_v45 }
 0x5da   : > { %v2310_v50 = vpop.eup %2309 }
 0x5db   : > { %v839_v46 = vpop.permute.xlu1 %838  ;;  %v933_v52 = vmul.f32 %v2310_v50, %v2304_v35  ;;  %v2205_v50 = vld [vmem:[%s2961_s14 + $0x28] sm:$0xff] }
 0x5dc   : > { %v844_v47 = vsel %vm784_vm5, %v839_v46, 0 }
 0x5dd   : > { %853 = vmatpush.bf16.msrb.mxu0 %v844_v47  ;;  %v934_v53 = vpack.c.bf16 %v933_v52, %v933_v52  ;;  %v2207_v47 = vld [vmem:[%s2961_s14 + $0x38] sm:$0xff] }
 0x5de   : > { %1246 = vmatpush.bf16.msrb.mxu2 %v2207_v47 }
 0x5e0   : > { %2028 = vmatmul.msk.bf16.vlgmr.msrb.gmra.mxu0 %vm747_vm6, %v837_v49  ;;  %v2280_v49 = vld [vmem:[%s2960_s13] ss:$0 sm:$0xff] }
 0x5e2   : > { %1247 = vmatpush.bf16.msrb.mxu2 %v2206_v48  ;;  %v2209_v48 = vld [vmem:[%s3005_s6 + $0x18] sm:$0xff] }
 0x5e3   : > { %1326 = vmatpush.bf16.msra.mxu3 %v2209_v48 }
 0x5e6   : > { %v936_v44 = vpop.permute.xlu0 %935  ;;  %1248 = vmatpush.bf16.msrb.mxu2 %v2205_v50 }
 0x5e7   : > { %v941_v51 = vsel %vm784_vm5, %v936_v44, 0 }
 0x5e8   : > { %950 = vmatpush.bf16.msra.mxu0 %v941_v51 }
 0x5ec   : > { %1051 = vmatpush.bf16.msrb.mxu0 %v1042_v5 }
 0x5f0   : > { %2033 = vmatmul.msk.bf16.vlgmr.msra.gmra.mxu0 %vm747_vm6, %v934_v53  ;;  %v2204_v53 = vld [vmem:[%s2961_s14 + $0x20] sm:$0xff] }
 0x5f1   : > { %1249 = vmatpush.bf16.msrb.mxu2 %v2204_v53 }
 0x5f5   : > { %1250 = vmatpush.bf16.msrb.mxu2 %v2203_v57  ;;  %v2282_v57 = vld [vmem:[%s3006_s29 + $0x1] ss:$0 sm:$0xff] }
 0x649   : > { %v1010_v56 = vpop.xlane.xlu1 %1009 }
 0x64a   : > { %2311 = vrcp.f32 %v1010_v56 }
 0x650   : > { %v2312_v59 = vpop.eup %2311 }
 0x651   : > { %v1012_v60 = vmul.f32 %v2312_v59, %v2306_v41 }
 0x653   : > { %v1013_v61 = vpack.c.bf16 %v1012_v60, %v1012_v60 }
 0x655   : > { %2037 = vmatmul.msk.bf16.vlgmr.msrb.gmra.mxu3 %vm747_vm6, %v1013_v61 }
 0x65d   : > { %v855_v62 = vpop.f32.mrf.mxu0 }
 0x65e   : > { %v859_v63 = vpack.c.bf16 %v855_v62, %v855_v62  ;;  %v2202_v62 = vld [vmem:[%s2961_s14 + $0x10] sm:$0xff] }
 0x65f   : > { %1251 = vmatpush.bf16.msrb.mxu2 %v2202_v62 }
 0x660   : > { %2030 = vmatmul.msk.bf16.vlgmr.msrb.gmra.mxu1 %vm747_vm6, %v859_v63 }
 0x665   : > { %v857_v0 = vpop.f32.mrf.mxu0 }
 0x66d   : > { %v952_v1 = vpop.f32.mrf.mxu0 }
 0x66e   : > { %v956_v2 = vpack.c.bf16 %v952_v1, %v952_v1 }
 0x670   : > { %2035 = vmatmul.msk.bf16.vlgmr.msra.gmra.mxu1 %vm747_vm6, %v956_v2 }
 0x675   : > { %v954_v3 = vpop.f32.mrf.mxu0 }
 0x676   : > { %v2201_v3 = vld [vmem:[%s2961_s14 + $0x8] sm:$0xff] }
 0x677   : > { %1252 = vmatpush.bf16.msrb.mxu2 %v2201_v3 }
 0x6d8   : > { %v1031_v6 = vpop.f32.mrf.mxu3 }
 0x6d9   : > { %v1035_v7 = vpack.c.bf16 %v1031_v6, %v1031_v6 }
 0x6db   : > { %2039 = vmatmul.msk.bf16.vlgmr.msrb.gmra.mxu0 %vm747_vm6, %v1035_v7  ;;  %v2200_v7 = vld [vmem:[%s2961_s14] sm:$0xff] }
 0x6dc   : > { %1253 = vmatpush.bf16.msrb.mxu2 %v2200_v7 }
 0x6dd   : > { %v877_v9 = vpop.f32.mrf.mxu1 }
 0x6de   : > { %v897_v12 = vadd.f32 %v2654_v22, %v877_v9 }
 0x6e0   : > { %v1033_v10 = vpop.f32.mrf.mxu3 }
 0x6e5   : > { %v879_v11 = vpop.f32.mrf.mxu1 }
 0x6ed   : > { %v974_v13 = vpop.f32.mrf.mxu1 }
 0x6ee   : > { %v978_v14 = vadd.f32 %v974_v13, %v897_v12 }
 0x6f5   : > { %v976_v15 = vpop.f32.mrf.mxu1 }
 0x758   : > { %v1053_v16 = vpop.f32.mrf.mxu0 }
 0x759   : > { %v1057_v18 = vadd.f32 %v1053_v16, %v978_v14 }
 0x75b   : > { %v1058_v20 = vadd.f32 %v1057_v18, %v2588_v8  ;;  %v2199_v8 = vld [vmem:[%s2959_s12 + $0x8] sm:$0xff] }
 0x75c   : > { %1126 = vmatpush.bf16.msrb.mxu1 %v2199_v8 }
 0x75d   : > { %v2690_v21 = vadd.f32 %v2277_v19, %v1058_v20 }
 0x75f   : > { %v1066_v23 = vsel %vm648_vm0, %v2690_v21, 0.0 }
 0x760   : > { %v1055_v24 = vpop.f32.mrf.mxu0  ;;  %1067 = vadd.xlane.f32.xlu2 %v1066_v23  ;;  %1127 = vmatpush.bf16.msrb.mxu1 %v2198_v29 }
 0x7d3   : > { %v1068_v25 = vpop.xlane.xlu2 %1067 }
 0x7d4   : > { %v1069_v22 = vmul.f32 %v1068_v25, %v2592_v17 }
 0x7d6   : > { %v1070_v26 = vsub.f32 %v2690_v21, %v1069_v22 }
 0x7d8   : > { %v1071_v27 = vmul.f32 %v1070_v26, %v1070_v26 }
 0x7da   : > { %v1072_v28 = vsel %vm648_vm0, %v1071_v27, 0.0 }
 0x7db   : > { %1073 = vadd.xlane.f32.xlu0 %v1072_v28 }
 0x84e   : > { %v1074_v30 = vpop.xlane.xlu0 %1073 }
 0x84f   : > { %v1075_v31 = vmul.f32 %v1074_v30, %v2592_v17 }
 0x851   : > { %v1076_v32 = vadd.f32 1e-05, %v1075_v31 }
 0x853   : > { %2313 = vrsqrt.f32 %v1076_v32  ;;  %vm1083_vm8 = vweird.f32 %v1076_v32 }
 0x859   : > { %v2314_v33 = vpop.eup %2313 }
 0x85a   : > { %v1078_v34 = vmul.f32 %v2314_v33, %v1076_v32  ;;  %vm1084_vm7 = vweird.f32 %v2314_v33 }
 0x85b   : > { %vm1085_vm9 = vmor %vm1083_vm8, %vm1084_vm7 }
 0x85c   : > { %v1079_v35 = vmul.f32 %v2314_v33, %v1078_v34 }
 0x85e   : > { %v1080_v36 = vmul.f32 0.5, %v1079_v35 }
 0x860   : > { %v1081_v37 = vsub.f32 1.5, %v1080_v36  ;;  %v2281_v36 = vld [vmem:[%s2962_s15] ss:$0 sm:$0xff] }
 0x862   : > { %v1082_v38 = vmul.f32 %v2314_v33, %v1081_v37 }
 0x864   : > { %v1086_v40 = vsel %vm1085_vm9, %v2314_v33, %v1082_v38 }
 0x865   : > { %v1087_v41 = vmul.f32 %v1086_v40, %v1070_v26 }
 0x867   : > { %v1091_v43 = vmul.f32 %v2278_v39, %v1087_v41 }
 0x869   : > { %v1095_v45 = vadd.f32 %v2279_v42, %v1091_v43 }
 0x86b   : > { %v1096_v46 = vpack.c.bf16 %v1095_v45, %v1095_v45 }
 0x86d   : > { %2048 = vmatmul.msk.bf16.vlgmr.msrb.gmra.mxu1 %vm648_vm0, %v1096_v46 }
 0x8ea   : > { %v1129_v44 = vpop.f32.mrf.mxu1 }
 0x8eb   : > { %v1130_v51 = vadd.f32 %v2280_v49, %v1129_v44 }
 0x8ed   : > { %v1134_v52 = vmul.f32 0.70710677, %v1130_v51  ;;  %v1133_v32 = vmul.f32 0.5, %v1130_v51 }
 0x8ef   : > { %v1135_v54 = vmul.f32 %v1134_v52, %v1134_v52 }
 0x8f1   : > { %v1136_v55 = vmin.f32 %v1135_v54, 16.0 }
 0x8f2   : > { %v1131_v56 = vpop.f32.mrf.mxu1 }
 0x8f3   : > { %v1137_v58 = vmul.f32 2.1237322e-06, %v1136_v55  ;;  %v1148_v59 = vmul.f32 3.8918573e-05, %v1136_v55 }
 0x8f5   : > { %v1138_v60 = vadd.f32 0.00028619796, %v1137_v58  ;;  %v1149_v61 = vadd.f32 0.001143296, %v1148_v59 }
 0x8f7   : > { %v1139_v63 = vmul.f32 %v1138_v60, %v1136_v55  ;;  %v1150_v0 = vmul.f32 %v1149_v61, %v1136_v55  ;;  %v2283_v60 = vld [vmem:[%s3007_s5 + $0x1] ss:$0 sm:$0xff]  ;;  %s620_s5 = scalar_lea.vmem [#allocation2], %s2005_s3  ;;  %s2361_s3 = scalar_lea.hbm %s2967_s20, 16 }
 0x8f9   : > { %v1151_v1 = vadd.f32 0.014752088, %v1150_v0  ;;  %v1140_v2 = vadd.f32 0.0036580483, %v1139_v63  ;;  %v2284_v0 = vld [vmem:[%s3008_s7 + $0x1] ss:$0 sm:$0xff] }
 0x8fb   : > { %v1152_v4 = vmul.f32 %v1151_v1, %v1136_v55  ;;  %v1141_v6 = vmul.f32 %v1140_v2, %v1136_v55 }
 0x8fd   : > { %v1153_v5 = vadd.f32 0.112945676, %v1152_v4  ;;  %v1142_v11 = vadd.f32 0.05243302, %v1141_v6 }
 0x8ff   : > { %v1154_v9 = vmul.f32 %v1153_v5, %v1136_v55  ;;  %v1143_v14 = vmul.f32 %v1142_v11, %v1136_v55  ;;  %v2100_v5 = vld [vmem:[%s2955_s8 + $0x10] sm:$0xf] }
 0x900   : > { %v1474_v6 = vsel %vm784_vm5, %v2100_v5, 0 }
 0x901   : > { %v1155_v10 = vadd.f32 0.4994258, %v1154_v9  ;;  %v1144_v15 = vadd.f32 0.18741608, %v1143_v14  ;;  %1483 = vmatpush.bf16.msra.mxu2 %v1474_v6 }
 0x903   : > { %v1156_v12 = vmul.f32 %v1155_v10, %v1136_v55  ;;  %v1145_v18 = vmul.f32 %v1144_v15, %v1136_v55 }
 0x905   : > { %v1157_v13 = vadd.f32 1.0, %v1156_v12  ;;  %v1146_v24 = vadd.f32 1.1283791, %v1145_v18 }
 0x907   : > { %2315 = vrcp.f32 %v1157_v13  ;;  %v1169_v23 = vand.u32 2147483648, %v1157_v13  ;;  %v1167_v22 = vand.u32 2147483647, %v1157_v13  ;;  %vm1163_vm11 = vweird.f32 %v1157_v13 }
 0x908   : > { %v1147_v28 = vmul.f32 %v1146_v24, %v1134_v52 }
 0x909   : > { %v1170_v27 = vor.u32 1.1754944e-38, %v1169_v23  ;;  %vm1168_vm13 = vcmp.eq.f32.partialorder %v1167_v22, 8.507059e+37 }
 0x90d   : > { %v2316_v16 = vpop.eup %2315 }
 0x90e   : > { %v1159_v19 = vmul.f32 %v2316_v16, %v1157_v13  ;;  %vm1164_vm10 = vweird.f32 %v2316_v16 }
 0x90f   : > { %vm1165_vm12 = vmor %vm1163_vm11, %vm1164_vm10 }
 0x910   : > { %v1160_v20 = vsub.f32 1.0, %v1159_v19 }
 0x912   : > { %v1161_v25 = vmul.f32 %v2316_v16, %v1160_v20 }
 0x914   : > { %v1162_v26 = vadd.f32 %v2316_v16, %v1161_v25 }
 0x916   : > { %v1166_v8 = vsel %vm1165_vm12, %v2316_v16, %v1162_v26 }
 0x917   : > { %v1171_v29 = vsel %vm1168_vm13, %v1170_v27, %v1166_v8 }
 0x918   : > { %v1172_v30 = vmul.f32 %v1171_v29, %v1147_v28 }
 0x91a   : > { %v2049_v31 = vclamps-f32 %v1172_v30, 1.0 }
 0x91c   : > { %v1175_v33 = vadd.f32 1.0, %v2049_v31 }
 0x91e   : > { %v1176_v34 = vmul.f32 %v1175_v33, %v1133_v32 }
 0x920   : > { %v1177_v35 = vpack.c.bf16 %v1176_v34, %v1176_v34 }
 0x922   : > { %1254 = vmatmul.bf16.vlgmr.msrb.gmra.mxu2 %v1177_v35 }
 0x9a5   : > { %v1255_v37 = vpop.f32.mrf.mxu2 }
 0x9a6   : > { %v1256_v38 = vadd.f32 %v2281_v36, %v1255_v37 }
 0x9a8   : > { %v2742_v39 = vadd.f32 %v1256_v38, %v2690_v21  ;;  %v2208_v21 = vld [vmem:[%s3005_s6 + $0x10] sm:$0xff] }
 0x9a9   : > { %1327 = vmatpush.bf16.msra.mxu3 %v2208_v21 }
 0x9aa   : > { %v1264_v40 = vsel %vm648_vm0, %v2742_v39, 0.0 }
 0x9ab   : > { %1265 = vadd.xlane.f32.xlu1 %v1264_v40 }
 0x9ad   : > { %v1257_v41 = vpop.f32.mrf.mxu2 }
 0xa1e   : > { %v1266_v42 = vpop.xlane.xlu1 %1265 }
 0xa1f   : > { %v1267_v43 = vmul.f32 %v1266_v42, %v2592_v17 }
 0xa21   : > { %v1268_v45 = vsub.f32 %v2742_v39, %v1267_v43 }
 0xa23   : > { %v1269_v46 = vmul.f32 %v1268_v45, %v1268_v45 }
 0xa25   : > { %v1270_v47 = vsel %vm648_vm0, %v1269_v46, 0.0 }
 0xa26   : > { %1271 = vadd.xlane.f32.xlu1 %v1270_v47 }
 0xa99   : > { %v1272_v49 = vpop.xlane.xlu1 %1271 }
 0xa9a   : > { %v1273_v44 = vmul.f32 %v1272_v49, %v2592_v17 }
 0xa9c   : > { %v1274_v50 = vadd.f32 1e-05, %v1273_v44 }
 0xa9e   : > { %2317 = vrsqrt.f32 %v1274_v50  ;;  %vm1281_vm15 = vweird.f32 %v1274_v50 }
 0xaa4   : > { %v2318_v51 = vpop.eup %2317 }
 0xaa5   : > { %v1276_v52 = vmul.f32 %v2318_v51, %v1274_v50  ;;  %vm1282_vm14 = vweird.f32 %v2318_v51 }
 0xaa6   : > { %vm1283_vm1 = vmor %vm1281_vm15, %vm1282_vm14 }
 0xaa7   : > { %v1277_v53 = vmul.f32 %v2318_v51, %v1276_v52 }
 0xaa9   : > { %v1278_v54 = vmul.f32 0.5, %v1277_v53 }
 0xaab   : > { %v1279_v55 = vsub.f32 1.5, %v1278_v54 }
 0xaad   : > { %v1280_v56 = vmul.f32 %v2318_v51, %v1279_v55 }
 0xaaf   : > { %v1284_v58 = vsel %vm1283_vm1, %v2318_v51, %v1280_v56 }
 0xab0   : > { %v1285_v59 = vmul.f32 %v1284_v58, %v1268_v45 }
 0xab2   : > { %v1289_v61 = vmul.f32 %v2282_v57, %v1285_v59 }
 0xab4   : > { %v1293_v62 = vadd.f32 %v2283_v60, %v1289_v61 }
 0xab6   : > { %v1294_v63 = vpack.c.bf16 %v1293_v62, %v1293_v62 }
 0xab8   : > { %2097 = vmatmul.msk.bf16.vlgmr.msra.gmra.mxu3 %vm648_vm0, %v1294_v63 }
 0xb3b   : > { %v1329_v1 = vpop.f32.mrf.mxu3 }
 0xb3c   : > { %v1330_v2 = vadd.f32 %v2284_v0, %v1329_v1 }
 0xb3e   : > { %v2766_v3 = vpack.c.bf16 %v1330_v2, %v1330_v2 }
 0xb40   : > { %1335 = vrot.lane.b32.xlu1 %v2766_v3, %s2407_s19  ;;  %s3010_s19 = smov 64  }
 0xb43   : > { %v1331_v4 = vpop.f32.mrf.mxu3 }
 0xb48   : > { %1392 = vrot.lane.b32.xlu1 %v2766_v3, %s2411_s27  ;;  %s3012_s27 = smov 88  }
 0xb50   : > { %1570 = vrot.lane.b32.xlu1 %v2766_v3, %s2408_s1  ;;  %s3011_s1 = smov 112  }
 0xb58   : > { %1491 = vrot.lane.b32.xlu1 %v2766_v3, %s3009_s24  ;;  %s2191_s24 = sshll.u32 %s2543_s2, 3  ;;  %s1927_s2 = scalar_lea.sflag [#allocation3], %s618_s25 }
 0xbb2   : > { %v1336_v7 = vpop.permute.xlu1 %1335 }
 0xbb3   : > { %v1341_v9 = vsel %vm747_vm6, %v1336_v7, 0 }
 0xbb4   : > { %1350 = vmatpush.bf16.xpose.msra.mxu0 %v1341_v9 }
 0xbba   : > { %v1393_v10 = vpop.permute.xlu1 %1392 }
 0xbbb   : > { %2098 = vmatmul.msk.bf16.vlgmr.msra.gmra.mxu0 %vm747_vm6, %v2766_v3 }
 0xbc2   : > { %v1571_v11 = vpop.permute.xlu1 %1570 }
 0xbc3   : > { %v1576_v12 = vsel %vm747_vm6, %v1571_v11, 0 }
 0xbc4   : > { %1585 = vmatpush.bf16.xpose.msrb.mxu2 %v1576_v12 }
 0xbca   : > { %v1492_v8 = vpop.permute.xlu1 %1491 }
 0xbcb   : > { %v1497_v31 = vsel %vm747_vm6, %v1492_v8, 0 }
 0xc38   : > { %v1352_v13 = vpop.f32.mrf.mxu0 }
 0xc39   : > { %v1356_v14 = vsel %vm747_vm6, %v1352_v13, -inf }
 0xc3a   : > { %1357 = vmax.xlane.f32.xlu2 %v1356_v14 }
 0xc40   : > { %v1354_v15 = vpop.f32.mrf.mxu0 }
 0xc52   : > { %1368 = vrot.lane.b32.xlu2 %v2766_v3, %s3010_s19 }
 0xc5a   : > { %1489 = vrot.lane.b32.xlu2 %v2766_v3, %s3011_s1  ;;  %s1937_s1 = scalar_lea.hbm %s2967_s20, %s2191_s24 }
 0xcad   : > { %v1358_v16 = vpop.xlane.xlu2 %1357 }
 0xcae   : > { %v1359_v18 = vsub.f32 %v1352_v13, %v1358_v16  ;;  %v2103_v13 = vld [vmem:[%s2955_s8 + $0x14] sm:$0xf] }
 0xcaf   : > { %v1455_v14 = vsel %vm784_vm5, %v2103_v13, 0 }
 0xcb0   : > { %v1360_v19 = vmul.f32 1.442695, %v1359_v18 }
 0xcb2   : > { %2319 = vpow2.f32 %v1360_v19 }
 0xcb5   : > { %v1369_v20 = vpop.permute.xlu2 %1368 }
 0xcb6   : > { %v1374_v23 = vsel %vm784_vm5, %v1369_v20, 0  ;;  %v2108_v20 = vld [vmem:[%s2955_s8 + $0x18] sm:$0xf] }
 0xcb7   : > { %1383 = vmatpush.bf16.msra.mxu1 %v1374_v23 }
 0xcb8   : > { %v2320_v24 = vpop.eup %2319 }
 0xcb9   : > { %v1362_v25 = vsel %vm747_vm6, %v2320_v24, 0.0 }
 0xcba   : > { %1363 = vadd.xlane.f32.xlu0 %v1362_v25 }
 0xcbb   : > { %1464 = vmatpush.bf16.msrb.mxu1 %v1455_v14  ;;  %v2216_v14 = vld [vmem:[%s2961_s14 + $0x60] sm:$0xff] }
 0xcbd   : > { %v1490_v32 = vpop.permute.xlu2 %1489 }
 0xcce   : > { %1394 = vrot.lane.b32.xlu0 %v2766_v3, %s3012_s27 }
 0xcd6   : > { %1568 = vrot.lane.b32.xlu0 %v2766_v3, %s3013_s0 }
 0xd2d   : > { %v1364_v22 = vpop.xlane.xlu0 %1363 }
 0xd2e   : > { %2321 = vrcp.f32 %v1364_v22 }
 0xd34   : > { %v2322_v26 = vpop.eup %2321 }
 0xd35   : > { %v1366_v27 = vmul.f32 %v2322_v26, %v2320_v24  ;;  %v1552_v24 = vsel %vm784_vm5, %v2108_v20, 0 }
 0xd37   : > { %v1367_v28 = vpack.c.bf16 %v1366_v27, %v1366_v27 }
 0xd39   : > { %2099 = vmatmul.msk.bf16.vlgmr.msra.gmra.mxu1 %vm747_vm6, %v1367_v28 }
 0xd3a   : > { %1561 = vmatpush.bf16.msra.mxu1 %v1552_v24 }
 0xd40   : > { %v1395_v29 = vpop.permute.xlu0 %1394 }
 0xd41   : > { %v1400_v30 = vsel %vm747_vm6, %v1395_v29, 0  ;;  %v2112_v29 = vld [vmem:[%s2955_s8 + $0x1c] sm:$0xf] }
 0xd42   : > { %1409 = vmatpush.bf16.xpose.msrb.mxu3 %v1400_v30  ;;  %v1631_v30 = vsel %vm784_vm5, %v2112_v29, 0 }
 0xd48   : > { %v1569_v36 = vpop.permute.xlu0 %1568 }
 0xd49   : > { %2101 = vmatmul.msk.bf16.vlgmr.msrb.gmra.mxu3 %vm747_vm6, %v1393_v10 }
 0xd4a   : > { %1506 = vmatpush.bf16.xpose.msra.mxu3 %v1497_v31 }
 0xd59   : > { %2106 = vmatmul.msk.bf16.vlgmr.msra.gmra.mxu3 %vm747_vm6, %v1490_v32 }
 0xdb6   : > { %v1385_v33 = vpop.f32.mrf.mxu1 }
 0xdb7   : > { %v1389_v34 = vpack.c.bf16 %v1385_v33, %v1385_v33 }
 0xdb9   : > { %2105 = vmatmul.msk.bf16.vlgmr.msra.gmra.mxu2 %vm747_vm6, %v1389_v34 }
 0xdbe   : > { %v1387_v35 = vpop.f32.mrf.mxu1 }
 0xdc9   : > { %2110 = vmatmul.msk.bf16.vlgmr.msrb.gmra.mxu2 %vm747_vm6, %v1569_v36 }
 0xdcc   : > { %v1411_v37 = vpop.f32.mrf.mxu3 }
 0xdcd   : > { %v1415_v38 = vsel %vm747_vm6, %v1411_v37, -inf }
 0xdce   : > { %1416 = vmax.xlane.f32.xlu1 %v1415_v38 }
 0xdd4   : > { %v1413_v40 = vpop.f32.mrf.mxu3 }
 0xddc   : > { %v1508_v41 = vpop.f32.mrf.mxu3 }
 0xddd   : > { %v1512_v42 = vsel %vm747_vm6, %v1508_v41, -inf }
 0xdde   : > { %1513 = vmax.xlane.f32.xlu2 %v1512_v42 }
 0xde4   : > { %v1510_v43 = vpop.f32.mrf.mxu3 }
 0xde5   : > { %v2285_v43 = vld [vmem:[%s2956_s9 + $0x1] ss:$0 sm:$0xff] }
 0xe3c   : > { %v2804_v45 = vpop.f32.mrf.mxu2 }
 0xe41   : > { %v1417_v46 = vpop.xlane.xlu1 %1416 }
 0xe42   : > { %v1418_v47 = vsub.f32 %v1411_v37, %v1417_v46 }
 0xe44   : > { %v1419_v48 = vmul.f32 1.442695, %v1418_v47  ;;  %v1487_v21 = vpop.f32.mrf.mxu2 }
 0xe46   : > { %2323 = vpow2.f32 %v1419_v48 }
 0xe4c   : > { %v2324_v49 = vpop.eup %2323  ;;  %v1587_v44 = vpop.f32.mrf.mxu2 }
 0xe4d   : > { %v1591_v50 = vsel %vm747_vm6, %v1587_v44, -inf  ;;  %v1421_v51 = vsel %vm747_vm6, %v2324_v49, 0.0 }
 0xe4e   : > { %1592 = vmax.xlane.f32.xlu0 %v1591_v50  ;;  %1422 = vadd.xlane.f32.xlu1 %v1421_v51 }
 0xe51   : > { %v1514_v52 = vpop.xlane.xlu2 %1513 }
 0xe52   : > { %v1515_v53 = vsub.f32 %v1508_v41, %v1514_v52  ;;  %v2210_v52 = vld [vmem:[%s2959_s12 + $0x10] sm:$0xff] }
 0xe54   : > { %v1516_v54 = vmul.f32 1.442695, %v1515_v53  ;;  %v1589_v55 = vpop.f32.mrf.mxu2 }
 0xe56   : > { %2325 = vpow2.f32 %v1516_v54 }
 0xe5c   : > { %v2326_v56 = vpop.eup %2325 }
 0xe5d   : > { %v1518_v57 = vsel %vm747_vm6, %v2326_v56, 0.0 }
 0xe5e   : > { %1519 = vadd.xlane.f32.xlu1 %v1518_v57 }
 0xe62   : > { %1427 = vrot.lane.b32.xlu0 %v2766_v3, %s3014_s28  ;;  %s3017_s28 = sld [smem:[#allocation19_spill]] }
 0xe77   : > { %1524 = vrot.lane.b32.xlu1 %v2766_v3, %s3015_s30  ;;  %s1939_s30 = sshll.u32 %s620_s5, 4  ;;  %s1940_s30 = int_to_ptr.vmem [resolvable:$true] %s1939_s30 }
 0xec1   : > { %v1593_v58 = vpop.xlane.xlu0 %1592  ;;  %v1423_v61 = vpop.xlane.xlu1 %1422 }
 0xec2   : > { %v1594_v59 = vsub.f32 %v1587_v44, %v1593_v58 }
 0xec4   : > { %v1595_v60 = vmul.f32 1.442695, %v1594_v59 }
 0xec6   : > { %2327 = vpow2.f32 %v1595_v60 }
 0xec7   : > { %2329 = vrcp.f32 %v1423_v61 }
 0xecc   : > { %v2328_v62 = vpop.eup %2327 }
 0xecd   : > { %v1597_v63 = vsel %vm747_vm6, %v2328_v62, 0.0  ;;  %v2330_v0 = vpop.eup %2329 }
 0xece   : > { %1598 = vadd.xlane.f32.xlu2 %v1597_v63  ;;  %v1425_v1 = vmul.f32 %v2330_v0, %v2324_v49 }
 0xed0   : > { %v1426_v5 = vpack.c.bf16 %v1425_v1, %v1425_v1  ;;  %v2287_v1 = vld [vmem:[%s2958_s11 + $0x1] ss:$0 sm:$0xff] }
 0xed1   : > { %v1520_v6 = vpop.xlane.xlu1 %1519 }
 0xed2   : > { %2331 = vrcp.f32 %v1520_v6  ;;  %v2219_v6 = vld [vmem:[%s2961_s14 + $0x78] sm:$0xff] }
 0xed3   : > { %1842 = vmatpush.bf16.msra.mxu2 %v2219_v6 }
 0xed4   : > { %v1428_v2 = vpop.permute.xlu0 %1427 }
 0xed5   : > { %v1433_v4 = vsel %vm784_vm5, %v1428_v2, 0 }
 0xed6   : > { %1442 = vmatpush.bf16.msrb.mxu0 %v1433_v4 }
 0xed8   : > { %v2332_v7 = vpop.eup %2331 }
 0xed9   : > { %2102 = vmatmul.msk.bf16.vlgmr.msrb.gmra.mxu0 %vm747_vm6, %v1426_v5  ;;  %v1522_v9 = vmul.f32 %v2332_v7, %v2326_v56  ;;  %v2218_v7 = vld [vmem:[%s2961_s14 + $0x70] sm:$0xff] }
 0xeda   : > { %1843 = vmatpush.bf16.msra.mxu2 %v2218_v7  ;;  %v2221_v7 = vld [vmem:[%s2965_s18 + $0x8] sm:$0xff] }
 0xedb   : > { %v1523_v12 = vpack.c.bf16 %v1522_v9, %v1522_v9  ;;  %v2288_v9 = vld [vmem:[%s2960_s13 + $0x1] ss:$0 sm:$0xff] }
 0xee6   : > { %1603 = vrot.lane.b32.xlu2 %v2766_v3, %s3016_s23  ;;  %s1941_s23 = sshll.u32 %s1937_s1, 4  ;;  %s1942_s23 = int_to_ptr.hbm [resolvable:$true] %s1941_s23 }
 0xee7   : > { %s2355_s6 = sshra.s32 %s1942_s23, 4  ;;  %s2356_s6 = int_to_ptr.hbm [resolvable:$true] %s2355_s6 }
 0xee8   : > { %s2357_s7 = scalar_lea.hbm %s2356_s6, 8  ;;  %p2362_p0 = scmp.lt.s32.totalorder %s2356_s6, %s2967_s20 }
 0xee9   : > { %v1525_v10 = vpop.permute.xlu1 %1524  ;;  %p2358_p11 = scmp.ne.s32.totalorder %s2356_s6, %s2357_s7  ;;  %p2363_p1 = scmp.lt.s32.totalorder %s2361_s3, %s2357_s7 }
 0xeea   : > { %v1530_v11 = vsel %vm784_vm5, %v1525_v10, 0 }
 0xeeb   : > { %1539 = vmatpush.bf16.msra.mxu0 %v1530_v11  ;;  %v2217_v11 = vld [vmem:[%s2961_s14 + $0x68] sm:$0xff]  ;;  %p2359_p12 = pnand %p2358_p11, %p2560_p5  ;;  %p2364_p2 = por %p2363_p1, %p2362_p0 }
 0xeec   : > { %1844 = vmatpush.bf16.msra.mxu2 %v2217_v11 }
 0xeed   : > { %p2360_p13 = pneg %p2359_p12 }
 0xeee   : > { %2107 = vmatmul.msk.bf16.vlgmr.msra.gmra.mxu0 %vm747_vm6, %v1523_v12 }
 0xeef   : > { %1640 = vmatpush.bf16.msrb.mxu0 %v1631_v30  ;;  %p2365_p3 = pnand %p2364_p2, %p2360_p13 }
 0xef0   : > { %1845 = vmatpush.bf16.msra.mxu2 %v2216_v14 }
 0xf41   : > { %v1599_v15 = vpop.xlane.xlu2 %1598 }
 0xf42   : > { %2333 = vrcp.f32 %v1599_v15 }
 0xf48   : > { %v2334_v16 = vpop.eup %2333 }
 0xf49   : > { %v1601_v18 = vmul.f32 %v2334_v16, %v2328_v62  ;;  %v1604_v3 = vpop.permute.xlu2 %1603  ;;  %v2286_v62 = vld [vmem:[%s2957_s10 + $0x1] ss:$0 sm:$0xff] }
 0xf4a   : > { %v1609_v19 = vsel %vm784_vm5, %v1604_v3, 0  ;;  %v2215_v3 = vld [vmem:[%s2961_s14 + $0x58] sm:$0xff] }
 0xf4b   : > { %v1602_v23 = vpack.c.bf16 %v1601_v18, %v1601_v18  ;;  %1618 = vmatpush.bf16.msrb.mxu3 %v1609_v19  ;;  %1846 = vmatpush.bf16.msra.mxu2 %v2215_v3  ;;  %v2290_v3 = vld [vmem:[%s2963_s16] ss:$0 sm:$0xff] }
 0xf4e   : > { %2111 = vmatmul.msk.bf16.vlgmr.msrb.gmra.mxu3 %vm747_vm6, %v1602_v23 }
 0xf4f   : > { %1918 = vmatpush.bf16.msra.mxu3 %v2221_v7 }
 0xf56   : > { %v1444_v25 = vpop.f32.mrf.mxu0 }
 0xf57   : > { %v1448_v22 = vpack.c.bf16 %v1444_v25, %v1444_v25  ;;  %v2214_v25 = vld [vmem:[%s2961_s14 + $0x50] sm:$0xff] }
 0xf58   : > { %1847 = vmatpush.bf16.msra.mxu2 %v2214_v25 }
 0xf59   : > { %2104 = vmatmul.msk.bf16.vlgmr.msrb.gmra.mxu1 %vm747_vm6, %v1448_v22 }
 0xf5e   : > { %v1446_v26 = vpop.f32.mrf.mxu0 }
 0xf6b   : > { %v1541_v27 = vpop.f32.mrf.mxu0 }
 0xf6c   : > { %v1545_v28 = vpack.c.bf16 %v1541_v27, %v1541_v27 }
 0xf6e   : > { %2109 = vmatmul.msk.bf16.vlgmr.msra.gmra.mxu1 %vm747_vm6, %v1545_v28 }
 0xf73   : > { %v1543_v8 = vpop.f32.mrf.mxu0 }
 0xf74   : > { %v2213_v8 = vld [vmem:[%s2961_s14 + $0x48] sm:$0xff] }
 0xf75   : > { %1848 = vmatpush.bf16.msra.mxu2 %v2213_v8 }
 0xfd1   : > { %v1620_v31 = vpop.f32.mrf.mxu3 }
 0xfd2   : > { %v1624_v32 = vpack.c.bf16 %v1620_v31, %v1620_v31 }
 0xfd4   : > { %2113 = vmatmul.msk.bf16.vlgmr.msrb.gmra.mxu0 %vm747_vm6, %v1624_v32  ;;  %v2212_v32 = vld [vmem:[%s2961_s14 + $0x40] sm:$0xff] }
 0xfd5   : > { %1849 = vmatpush.bf16.msra.mxu2 %v2212_v32 }
 0xfd6   : > { %v1466_v33 = vpop.f32.mrf.mxu1 }
 0xfd7   : > { %v1486_v36 = vadd.f32 %v2804_v45, %v1466_v33 }
 0xfd9   : > { %v1622_v34 = vpop.f32.mrf.mxu3 }
 0xfde   : > { %v1468_v35 = vpop.f32.mrf.mxu1 }
 0xfeb   : > { %v1563_v37 = vpop.f32.mrf.mxu1 }
 0xfec   : > { %v1567_v38 = vadd.f32 %v1563_v37, %v1486_v36 }
 0xff3   : > { %v1565_v40 = vpop.f32.mrf.mxu1 }
0x1051   : > { %v1642_v41 = vpop.f32.mrf.mxu0 }
0x1052   : > { %v1646_v42 = vadd.f32 %v1642_v41, %v1567_v38 }
0x1054   : > { %v1647_v46 = vadd.f32 %v1646_v42, %v2742_v39  ;;  %v2211_v39 = vld [vmem:[%s2959_s12 + $0x18] sm:$0xff] }
0x1055   : > { %1720 = vmatpush.bf16.msrb.mxu1 %v2211_v39 }
0x1056   : > { %v2842_v47 = vadd.f32 %v2285_v43, %v1647_v46 }
0x1058   : > { %v1658_v48 = vsel %vm648_vm0, %v2842_v47, 0.0 }
0x1059   : > { %1659 = vadd.xlane.f32.xlu0 %v1658_v48  ;;  %v1644_v21 = vpop.f32.mrf.mxu0  ;;  %1721 = vmatpush.bf16.msrb.mxu1 %v2210_v52 }
0x10cc   : > { %v1660_v49 = vpop.xlane.xlu0 %1659 }
0x10cd   : > { %v1661_v45 = vmul.f32 %v1660_v49, %v2592_v17 }
0x10cf   : > { %v1662_v44 = vsub.f32 %v2842_v47, %v1661_v45 }
0x10d1   : > { %v1663_v50 = vmul.f32 %v1662_v44, %v1662_v44 }
0x10d3   : > { %v1664_v51 = vsel %vm648_vm0, %v1663_v50, 0.0 }
0x10d4   : > { %1665 = vadd.xlane.f32.xlu2 %v1664_v51 }
0x1147   : > { %v1666_v53 = vpop.xlane.xlu2 %1665 }
0x1148   : > { %v1667_v54 = vmul.f32 %v1666_v53, %v2592_v17 }
0x114a   : > { %v1668_v55 = vadd.f32 1e-05, %v1667_v54 }
0x114c   : > { %2335 = vrsqrt.f32 %v1668_v55  ;;  %vm1675_vm3 = vweird.f32 %v1668_v55 }
0x1152   : > { %v2336_v56 = vpop.eup %2335 }
0x1153   : > { %v1670_v57 = vmul.f32 %v2336_v56, %v1668_v55  ;;  %vm1676_vm2 = vweird.f32 %v2336_v56 }
0x1154   : > { %vm1677_vm4 = vmor %vm1675_vm3, %vm1676_vm2 }
0x1155   : > { %v1671_v58 = vmul.f32 %v2336_v56, %v1670_v57 }
0x1157   : > { %v1672_v59 = vmul.f32 0.5, %v1671_v58 }
0x1159   : > { %v1673_v60 = vsub.f32 1.5, %v1672_v59  ;;  %v2289_v59 = vld [vmem:[%s2962_s15 + $0x1] ss:$0 sm:$0xff] }
0x115b   : > { %v1674_v61 = vmul.f32 %v2336_v56, %v1673_v60 }
0x115d   : > { %v1678_v63 = vsel %vm1677_vm4, %v2336_v56, %v1674_v61 }
0x115e   : > { %v1679_v0 = vmul.f32 %v1678_v63, %v1662_v44 }
0x1160   : > { %v1683_v2 = vmul.f32 %v2286_v62, %v1679_v0 }
0x1162   : > { %v1687_v4 = vadd.f32 %v2287_v1, %v1683_v2 }
0x1164   : > { %v1688_v5 = vpack.c.bf16 %v1687_v4, %v1687_v4 }
0x1166   : > { %2130 = vmatmul.msk.bf16.vlgmr.msrb.gmra.mxu1 %vm648_vm0, %v1688_v5 }
0x11e3   : > { %v1723_v10 = vpop.f32.mrf.mxu1 }
0x11e4   : > { %v1724_v12 = vadd.f32 %v2288_v9, %v1723_v10 }
0x11e6   : > { %v1728_v13 = vmul.f32 0.70710677, %v1724_v12  ;;  %v1727_v55 = vmul.f32 0.5, %v1724_v12 }
0x11e8   : > { %v1729_v15 = vmul.f32 %v1728_v13, %v1728_v13 }
0x11ea   : > { %v1730_v16 = vmin.f32 %v1729_v15, 16.0 }
0x11eb   : > { %v1725_v18 = vpop.f32.mrf.mxu1 }
0x11ec   : > { %v1731_v19 = vmul.f32 2.1237322e-06, %v1730_v16  ;;  %v1742_v20 = vmul.f32 3.8918573e-05, %v1730_v16 }
0x11ee   : > { %v1732_v23 = vadd.f32 0.00028619796, %v1731_v19  ;;  %v1743_v24 = vadd.f32 0.001143296, %v1742_v20 }
0x11f0   : > { %v1733_v22 = vmul.f32 %v1732_v23, %v1730_v16  ;;  %v1744_v26 = vmul.f32 %v1743_v24, %v1730_v16 }
0x11f2   : > { %v1745_v27 = vadd.f32 0.014752088, %v1744_v26  ;;  %v1734_v28 = vadd.f32 0.0036580483, %v1733_v22  ;;  %v2292_v22 = vld [vmem:[%s3017_s28] ss:$0 sm:$0xff] }
0x11f4   : > { %v1746_v29 = vmul.f32 %v1745_v27, %v1730_v16  ;;  %v1735_v31 = vmul.f32 %v1734_v28, %v1730_v16 }
0x11f6   : > { %v1747_v30 = vadd.f32 0.112945676, %v1746_v29  ;;  %v1736_v35 = vadd.f32 0.05243302, %v1735_v31 }
0x11f8   : > { %v1748_v33 = vmul.f32 %v1747_v30, %v1730_v16  ;;  %v1737_v38 = vmul.f32 %v1736_v35, %v1730_v16 }
0x11fa   : > { %v1749_v34 = vadd.f32 0.4994258, %v1748_v33  ;;  %v1738_v40 = vadd.f32 0.18741608, %v1737_v38 }
0x11fc   : > { %v1750_v36 = vmul.f32 %v1749_v34, %v1730_v16  ;;  %v1739_v42 = vmul.f32 %v1738_v40, %v1730_v16 }
0x11fe   : > { %v1751_v37 = vadd.f32 1.0, %v1750_v36  ;;  %v1740_v21 = vadd.f32 1.1283791, %v1739_v42 }
0x1200   : > { %2337 = vrcp.f32 %v1751_v37  ;;  %v1763_v48 = vand.u32 2147483648, %v1751_v37  ;;  %v1761_v45 = vand.u32 2147483647, %v1751_v37  ;;  %vm1757_vm6 = vweird.f32 %v1751_v37 }
0x1201   : > { %v1741_v51 = vmul.f32 %v1740_v21, %v1728_v13 }
0x1202   : > { %v1764_v50 = vor.u32 1.1754944e-38, %v1763_v48  ;;  %vm1762_vm8 = vcmp.eq.f32.partialorder %v1761_v45, 8.507059e+37 }
0x1206   : > { %v2338_v41 = vpop.eup %2337 }
0x1207   : > { %v1753_v43 = vmul.f32 %v2338_v41, %v1751_v37  ;;  %vm1758_vm5 = vweird.f32 %v2338_v41 }
0x1208   : > { %vm1759_vm7 = vmor %vm1757_vm6, %vm1758_vm5 }
0x1209   : > { %v1754_v46 = vsub.f32 1.0, %v1753_v43 }
0x120b   : > { %v1755_v49 = vmul.f32 %v2338_v41, %v1754_v46 }
0x120d   : > { %v1756_v44 = vadd.f32 %v2338_v41, %v1755_v49 }
0x120f   : > { %v1760_v39 = vsel %vm1759_vm7, %v2338_v41, %v1756_v44 }
0x1210   : > { %v1765_v52 = vsel %vm1762_vm8, %v1764_v50, %v1760_v39 }
0x1211   : > { %v1766_v53 = vmul.f32 %v1765_v52, %v1741_v51 }
0x1213   : > { %v2131_v54 = vclamps-f32 %v1766_v53, 1.0 }
0x1215   : > { %v1769_v56 = vadd.f32 1.0, %v2131_v54 }
0x1217   : > { %v1770_v57 = vmul.f32 %v1769_v56, %v1727_v55 }
0x1219   : > { %v1771_v58 = vpack.c.bf16 %v1770_v57, %v1770_v57 }
0x121b   : > { %1850 = vmatmul.bf16.vlgmr.msra.gmra.mxu2 %v1771_v58 }
0x129e   : > { %v1851_v60 = vpop.f32.mrf.mxu2 }
0x129f   : > { %v1852_v61 = vadd.f32 %v2289_v59, %v1851_v60 }
0x12a1   : > { %v1855_v62 = vadd.f32 %v1852_v61, %v2842_v47  ;;  %v2220_v47 = vld [vmem:[%s2965_s18] sm:$0xff] }
0x12a2   : > { %1919 = vmatpush.bf16.msra.mxu3 %v2220_v47 }
0x12a3   : > { %v1858_v63 = vsel %vm648_vm0, %v1855_v62, 0.0 }
0x12a4   : > { %1859 = vadd.xlane.f32.xlu1 %v1858_v63 }
0x12a6   : > { %v1853_v0 = vpop.f32.mrf.mxu2 }
0x1317   : > { %v1860_v1 = vpop.xlane.xlu1 %1859 }
0x1318   : > { %v1861_v2 = vmul.f32 %v1860_v1, %v2592_v17 }
0x131a   : > { %v1862_v4 = vsub.f32 %v1855_v62, %v1861_v2 }
0x131c   : > { %v1863_v5 = vmul.f32 %v1862_v4, %v1862_v4 }
0x131e   : > { %v1864_v6 = vsel %vm648_vm0, %v1863_v5, 0.0 }
0x131f   : > { %1865 = vadd.xlane.f32.xlu0 %v1864_v6 }
0x1392   : > { %v1866_v9 = vpop.xlane.xlu0 %1865 }
0x1393   : > { %v1867_v10 = vmul.f32 %v1866_v9, %v2592_v17  ;;  %v2291_v17 = vld [vmem:[%s2964_s17] ss:$0 sm:$0xff] }
0x1395   : > { %v1868_v11 = vadd.f32 1e-05, %v1867_v10 }
0x1397   : > { %2339 = vrsqrt.f32 %v1868_v11  ;;  %vm1875_vm10 = vweird.f32 %v1868_v11 }
0x139d   : > { %v2340_v12 = vpop.eup %2339 }
0x139e   : > { %v1870_v13 = vmul.f32 %v2340_v12, %v1868_v11  ;;  %vm1876_vm9 = vweird.f32 %v2340_v12 }
0x139f   : > { %vm1877_vm11 = vmor %vm1875_vm10, %vm1876_vm9 }
0x13a0   : > { %v1871_v14 = vmul.f32 %v2340_v12, %v1870_v13 }
0x13a2   : > { %v1872_v15 = vmul.f32 0.5, %v1871_v14 }
0x13a4   : > { %v1873_v16 = vsub.f32 1.5, %v1872_v15 }
0x13a6   : > { %v1874_v18 = vmul.f32 %v2340_v12, %v1873_v16 }
0x13a8   : > { %v1878_v19 = vsel %vm1877_vm11, %v2340_v12, %v1874_v18 }
0x13a9   : > { %v1879_v20 = vmul.f32 %v1878_v19, %v1862_v4 }
0x13ab   : > { %v1883_v23 = vmul.f32 %v2290_v3, %v1879_v20 }
0x13ad   : > { %v1887_v24 = vadd.f32 %v2291_v17, %v1883_v23 }
0x13af   : > { %v1888_v25 = vpack.c.bf16 %v1887_v24, %v1887_v24 }
0x13b1   : > { %2189 = vmatmul.msk.bf16.vlgmr.msra.gmra.mxu3 %vm648_vm0, %v1888_v25 }
0x1434   : > { %v1921_v26 = vpop.f32.mrf.mxu3 }
0x1435   : > { %v1922_v27 = vadd.f32 %v2292_v22, %v1921_v26 }
0x1437   : > { %1925 = vst.msk [vmem:[%s620_s5] sm:$0xff] %vm648_vm0, %v1922_v27 }
0x1438   : > { %2368 = shalt.err (!%p2365_p3)
}
0x1439   : > { %2222 = dma.vmem_to_hbm [thread:$0]  (%p2560_p5), %s1940_s30, 128, %s1942_s23, %s1927_s2  }
0x143c   : > { %v1923_v28 = vpop.f32.mrf.mxu3 }
0x143d PF: > { %s3018_s5 = sld [smem:[#allocation7_spill]] }
0x143e   : > { %s3019_s25 = sld [smem:[#allocation5_spill]] }
0x1443   : > { %p2228_p4 = scmp.ge.s32.totalorder %s3018_s5, 2 }
0x1444   : > { %s1953_s0 = sand.u32 1, %s3019_s25  }
0x1445   : > { %p2225_p7 = pnand %p2228_p4, %p2564_p6  ;;  %s1954_s28 = scalar_lea.sflag [#allocation3], %s1953_s0 }
0x1447   : > { %p2226_p8 = pneg %p2225_p7 }
0x1449   : > { %2386 = dma.done.wait (%p2226_p8), %s1954_s28, 128  }
0x144a   : > { %2388 = vsyncadd (%p2226_p8), %s1954_s28, 4294967168  ;;  %s3021_s24 = sld [smem:[#allocation8_spill]]  ;;  %s3024_s1 = smov %s2395_s22 }
0x144b   : > { %s3022_s6 = sld [smem:[#allocation6_spill]] }
0x144c   : > { %s3023_s23 = sld [smem:[#allocation9_spill]] }
0x1450   : > { %p30_p9 = scmp.ge.s32.totalorder %s3021_s24, 4  }
0x1451   : > { %s3025_s22 = smov %s3022_s6 }
0x1452   :  { %32 = sbr.rel (!%p30_p9) target bundleno = 13 (0xd), region = 153 }
0x1457   :  { %1960 = vsyncpa [#allocation3], 1 }
0x1458   :  { %1962 = vsyncpa [#allocation3 + $0x1], 1 }

</bundles_post_ra>
